<compile_context>
chip_gen: v7x
topology: tpu7x:2x2x1
jax: 0.10.0
libtpu: 0.0.40
codegen_flags: <defaults>
</compile_context>

<pallas_src>
import functools

import jax
import jax.numpy as jnp
from jax.experimental import pallas as pl
from jax.experimental.pallas import tpu as pltpu


def _nodenn_kernel(xp_hbm, a_ref, b1_ref, bk_ref, b2_ref,
                   w3_ref, b3_ref, w4_ref, b4_ref,
                   w5_ref, b5_ref, w6_ref, b6_ref,
                   out_ref, x_vmem, c1_vmem, dma_sem,
                   *, tn, n_valid, apply_sigmoid):
    f32 = jnp.float32
    bf16 = jnp.bfloat16
    i = pl.program_id(0)
    base = pl.multiple_of(i * tn, tn)

    # Fetch only this tile's (tn + 4)-row halo window of the zero-padded
    # input: rows [base, base + tn + 4) of xp cover the receptive field of
    # the two stacked k=3 'same' convolutions for output rows [base, base+tn).
    cp = pltpu.make_async_copy(xp_hbm.at[pl.ds(base, tn + 4)], x_vmem, dma_sem)
    cp.start()
    cp.wait()

    # ReLU + im2col of the 3 conv taps along lanes -> a single K=3F MXU matmul
    # instead of three shallow K=F matmuls.
    rw = jnp.concatenate(
        [x_vmem[0:tn + 2, :], x_vmem[1:tn + 3, :], x_vmem[2:tn + 4, :]],
        axis=-1)                                                   # [tn+2, 3F]
    rw = jnp.maximum(rw, 0.0).astype(bf16)
    c1 = jnp.dot(rw, a_ref[...], preferred_element_type=f32) + b1_ref[...]

    # PyTorch zero-pads the conv1 OUTPUT before the second 'same' conv, so
    # halo rows whose global conv1 index falls outside [0, N) must be zero
    # (this also kills the padded tail nodes' contribution to valid rows).
    g = base - 1 + jax.lax.broadcasted_iota(jnp.int32, (tn + 2, 1), 0)
    c1 = jnp.where((g >= 0) & (g < n_valid), c1, 0.0)
    c1_vmem[...] = c1.astype(bf16)                                 # [tn+2, 512]

    # Conv1d(512 -> 256, k=3, 'same'): three shifted windows read back from
    # the VMEM scratch feed the MXU directly (no value-slice copies).
    c2 = (jnp.dot(c1_vmem[0:tn, :], bk_ref[0], preferred_element_type=f32)
          + jnp.dot(c1_vmem[1:tn + 1, :], bk_ref[1], preferred_element_type=f32)
          + jnp.dot(c1_vmem[2:tn + 2, :], bk_ref[2], preferred_element_type=f32)
          + b2_ref[...])                                           # [tn, 256]

    # Dropout(p=0.2) layers are identity at inference (eval mode).
    h = jnp.maximum(c2, 0.0).astype(bf16)
    h = jnp.maximum(jnp.dot(h, w3_ref[...], preferred_element_type=f32)
                    + b3_ref[...], 0.0).astype(bf16)               # [tn, 128]
    h = jnp.maximum(jnp.dot(h, w4_ref[...], preferred_element_type=f32)
                    + b4_ref[...], 0.0).astype(bf16)               # [tn, 64]
    z = jnp.dot(h, w5_ref[...], preferred_element_type=f32) + b5_ref[...]  # [tn, 16]

    # compressing_layers: ReLU -> (Dropout id) -> Linear(16, 1).
    # Narrow output: lane reduction instead of a degenerate [16, 1] matmul.
    y = (jnp.sum(jnp.maximum(z, 0.0) * w6_ref[...], axis=-1, keepdims=True)
         + b6_ref[...])                                            # [tn, 1]
    if apply_sigmoid:
        y = jax.nn.sigmoid(y)
    out_ref[...] = y.astype(out_ref.dtype)


def _round_up(v, m):
    return (v + m - 1) // m * m


def nodenn_forward(x, params, *, sigmoid=True, tile_n=256):
    """Pallas implementation of NodeNN.forward (inference)."""
    n, f = x.shape

    # tile_n=256 fills the MXU M dim; cap so small N still gives >= 2 grid
    # steps (keeps both v7x TensorCores busy) and keep it sublane-aligned.
    tile_n = max(8, min(_round_up(tile_n, 8), _round_up(pl.cdiv(n, 2), 8)))
    n_tiles = pl.cdiv(n, tile_n)
    n_pad = n_tiles * tile_n

    # Zero-pad 2 rows on each side: matches Conv1d 'same' zero padding of the
    # input and provides the two-layer conv halo. The array stays in HBM
    # (pl.ANY); each grid step DMAs only its windowed slab.
    xp = jnp.zeros((n_pad + 4, f), jnp.float32).at[2:2 + n].set(
        x.astype(jnp.float32))

    f32, bf16 = jnp.float32, jnp.bfloat16
    # Repack weights into kernel layout (lane-dense, matmul-ready); bf16 MXU
    # operands, f32 accumulation in-kernel.
    a = jnp.transpose(params["w1"].astype(f32), (2, 1, 0)).reshape(3 * f, 512)
    a = a.astype(bf16)                                              # [3F, 512]
    bk = jnp.transpose(params["w2"].astype(f32), (2, 1, 0)).astype(bf16)  # [3,512,256]
    b1 = params["b1"].astype(f32).reshape(1, 512)
    b2 = params["b2"].astype(f32).reshape(1, 256)
    w3 = params["w3"].astype(f32).T.astype(bf16)                    # [256, 128]
    b3 = params["b3"].astype(f32).reshape(1, 128)
    w4 = params["w4"].astype(f32).T.astype(bf16)                    # [128, 64]
    b4 = params["b4"].astype(f32).reshape(1, 64)
    w5 = params["w5"].astype(f32).T.astype(bf16)                    # [64, 16]
    b5 = params["b5"].astype(f32).reshape(1, 16)
    w6 = params["w6"].astype(f32).reshape(1, 16)                    # row vector
    b6 = params["b6"].astype(f32).reshape(1, 1)

    const2 = lambda i: (0, 0)
    const3 = lambda i: (0, 0, 0)

    out = pl.pallas_call(
        functools.partial(_nodenn_kernel, tn=tile_n, n_valid=n,
                          apply_sigmoid=sigmoid),
        out_shape=jax.ShapeDtypeStruct((n_pad, 1), jnp.float32),
        grid=(n_tiles,),
        in_specs=[
            pl.BlockSpec(memory_space=pl.ANY),        # padded input, in HBM
            pl.BlockSpec((3 * f, 512), const2),       # conv1 weights (im2col)
            pl.BlockSpec((1, 512), const2),           # conv1 bias
            pl.BlockSpec((3, 512, 256), const3),      # conv2 weights
            pl.BlockSpec((1, 256), const2),           # conv2 bias
            pl.BlockSpec((256, 128), const2),         # linear 256->128
            pl.BlockSpec((1, 128), const2),
            pl.BlockSpec((128, 64), const2),          # linear 128->64
            pl.BlockSpec((1, 64), const2),
            pl.BlockSpec((64, 16), const2),           # linear 64->16
            pl.BlockSpec((1, 16), const2),
            pl.BlockSpec((1, 16), const2),            # linear 16->1 (row vec)
            pl.BlockSpec((1, 1), const2),
        ],
        out_specs=pl.BlockSpec((tile_n, 1), lambda i: (i, 0)),
        scratch_shapes=[
            pltpu.VMEM((tile_n + 4, f), jnp.float32),     # input halo window
            pltpu.VMEM((tile_n + 2, 512), jnp.bfloat16),  # conv1 output tile
            pltpu.SemaphoreType.DMA,
        ],
        compiler_params=pltpu.CompilerParams(
            dimension_semantics=("parallel",),
            vmem_limit_bytes=32 * 1024 * 1024),
    )(xp, a, b1, bk, b2, w3, b3, w4, b4, w5, b5, w6, b6)
    return out[:n]


def nodenn_reference(x, p, sigmoid=True):
    """Pure-JAX reference with PyTorch-layout weights (f32, highest precision)."""
    prec = jax.lax.Precision.HIGHEST
    r = jnp.maximum(x, 0.0)            # [N, F]
    h = r.T                            # [F, N] == (C_in, L) unbatched Conv1d input

    def conv1d_same(h, w, b):
        length = h.shape[1]
        hpad = jnp.pad(h, ((0, 0), (1, 1)))
        out = b[:, None]
        for k in range(3):
            out = out + jnp.dot(w[:, :, k], hpad[:, k:k + length], precision=prec)
        return out

    h = conv1d_same(h, p["w1"], p["b1"])      # [512, N]
    h = conv1d_same(h, p["w2"], p["b2"])      # [256, N]
    h = jnp.maximum(h.T, 0.0)                 # [N, 256]  (Dropout = identity, eval)
    h = jnp.maximum(jnp.dot(h, p["w3"].T, precision=prec) + p["b3"], 0.0)
    h = jnp.maximum(jnp.dot(h, p["w4"].T, precision=prec) + p["b4"], 0.0)
    z = jnp.dot(h, p["w5"].T, precision=prec) + p["b5"]
    y = jnp.dot(jnp.maximum(z, 0.0), p["w6"].T, precision=prec) + p["b6"]
    return jax.nn.sigmoid(y) if sigmoid else y


if __name__ == "__main__":
    input_dim = 32
    num_nodes = 128

    key = jax.random.PRNGKey(0)
    ks = jax.random.split(key, 13)

    def init(k, shape, scale=0.05):
        return scale * jax.random.normal(k, shape, dtype=jnp.float32)

    # Parameters in PyTorch layout.
    params = {
        "w1": init(ks[0], (512, input_dim, 3)), "b1": init(ks[1], (512,)),
        "w2": init(ks[2], (256, 512, 3)),       "b2": init(ks[3], (256,)),
        "w3": init(ks[4], (128, 256)),          "b3": init(ks[5], (128,)),
        "w4": init(ks[6], (64, 128)),           "b4": init(ks[7], (64,)),
        "w5": init(ks[8], (16, 64)),            "b5": init(ks[9], (16,)),
        "w6": init(ks[10], (1, 16)),            "b6": init(ks[11], (1,)),
    }
    x = jax.random.normal(ks[12], (num_nodes, input_dim), dtype=jnp.float32)

    # TODO(synk): training-mode Dropout masking is not implemented (eval-mode identity).
    y_sig = nodenn_forward(x, params, sigmoid=True)
    y_logit = nodenn_forward(x, params, sigmoid=False)
    jax.block_until_ready((y_sig, y_logit))

    ref_sig = nodenn_reference(x, params, sigmoid=True)
    ref_logit = nodenn_reference(x, params, sigmoid=False)

    assert y_sig.shape == (num_nodes, 1) and y_logit.shape == (num_nodes, 1)
    # Kernel feeds the MXU bf16 operands (f32 accumulation); reference is f32.
    assert bool(jnp.allclose(y_logit, ref_logit, atol=1e-2, rtol=1e-2)), "logit mismatch"
    assert bool(jnp.allclose(y_sig, ref_sig, atol=5e-3, rtol=5e-3)), "sigmoid mismatch"
    print("KERNEL_OK")
</pallas_src>

<mosaic_0001>
module attributes {stable_mosaic.version = 11 : i64} {
  func.func @_nodenn_kernel(%arg0: i32, %arg1: memref<132x32xf32, #tpu.memory_space<any>>, %arg2: memref<96x512xbf16, #tpu.memory_space<vmem>>, %arg3: memref<1x512xf32, #tpu.memory_space<vmem>>, %arg4: memref<3x512x256xbf16, #tpu.memory_space<vmem>>, %arg5: memref<1x256xf32, #tpu.memory_space<vmem>>, %arg6: memref<256x128xbf16, #tpu.memory_space<vmem>>, %arg7: memref<1x128xf32, #tpu.memory_space<vmem>>, %arg8: memref<128x64xbf16, #tpu.memory_space<vmem>>, %arg9: memref<1x64xf32, #tpu.memory_space<vmem>>, %arg10: memref<64x16xbf16, #tpu.memory_space<vmem>>, %arg11: memref<1x16xf32, #tpu.memory_space<vmem>>, %arg12: memref<1x16xf32, #tpu.memory_space<vmem>>, %arg13: memref<1x1xf32, #tpu.memory_space<vmem>>, %arg14: memref<64x1xf32, #tpu.memory_space<vmem>>, %arg15: memref<68x32xf32, #tpu.memory_space<vmem>>, %arg16: memref<66x512xbf16, #tpu.memory_space<vmem>>, %arg17: memref<!tpu.dma_semaphore, #tpu.memory_space<semaphore_mem>>) attributes {dimension_semantics = [#tpu.dimension_semantics<parallel>], iteration_bounds = array<i64: 2>, scalar_prefetch = 0 : i64, scratch_operands = 3 : i64, tpu.core_type = #tpu.core_type<tc>, window_params = [{}, {pipeline_mode = #tpu.pipeline_mode<synchronous>, transform_indices = @transform_1, window_bounds = array<i64: 96, 512>}, {pipeline_mode = #tpu.pipeline_mode<synchronous>, transform_indices = @transform_2, window_bounds = array<i64: 1, 512>}, {pipeline_mode = #tpu.pipeline_mode<synchronous>, transform_indices = @transform_3, window_bounds = array<i64: 3, 512, 256>}, {pipeline_mode = #tpu.pipeline_mode<synchronous>, transform_indices = @transform_4, window_bounds = array<i64: 1, 256>}, {pipeline_mode = #tpu.pipeline_mode<synchronous>, transform_indices = @transform_5, window_bounds = array<i64: 256, 128>}, {pipeline_mode = #tpu.pipeline_mode<synchronous>, transform_indices = @transform_6, window_bounds = array<i64: 1, 128>}, {pipeline_mode = #tpu.pipeline_mode<synchronous>, transform_indices = @transform_7, window_bounds = array<i64: 128, 64>}, {pipeline_mode = #tpu.pipeline_mode<synchronous>, transform_indices = @transform_8, window_bounds = array<i64: 1, 64>}, {pipeline_mode = #tpu.pipeline_mode<synchronous>, transform_indices = @transform_9, window_bounds = array<i64: 64, 16>}, {pipeline_mode = #tpu.pipeline_mode<synchronous>, transform_indices = @transform_10, window_bounds = array<i64: 1, 16>}, {pipeline_mode = #tpu.pipeline_mode<synchronous>, transform_indices = @transform_11, window_bounds = array<i64: 1, 16>}, {pipeline_mode = #tpu.pipeline_mode<synchronous>, transform_indices = @transform_12, window_bounds = array<i64: 1, 1>}, {transform_indices = @transform_13, window_bounds = array<i64: 64, 1>}]} {
    %c64_i32 = arith.constant 64 : i32
    %0 = arith.muli %arg0, %c64_i32 : i32
    %1 = tpu.assume_multiple %0, 64 : i32
    %c0_i32 = arith.constant 0 : i32
    %2 = tpu.memref_slice %arg1[%1, %c0_i32] : memref<132x32xf32, #tpu.memory_space<any>> -> memref<68x32xf32, #tpu.memory_space<any>>
    tpu.enqueue_dma source(%2 : memref<68x32xf32, #tpu.memory_space<any>>) target(%arg15 : memref<68x32xf32, #tpu.memory_space<vmem>>) target_semaphore(%arg17 : memref<!tpu.dma_semaphore, #tpu.memory_space<semaphore_mem>>)
    %c0_i32_0 = arith.constant 0 : i32
    %3 = tpu.memref_slice %arg1[%1, %c0_i32_0] : memref<132x32xf32, #tpu.memory_space<any>> -> memref<68x32xf32, #tpu.memory_space<any>>
    tpu.wait_dma2 semaphore(%arg17 : memref<!tpu.dma_semaphore, #tpu.memory_space<semaphore_mem>>) src(%3 : memref<68x32xf32, #tpu.memory_space<any>>) dst(%arg15 : memref<68x32xf32, #tpu.memory_space<vmem>>)
    %c0 = arith.constant 0 : index
    %c0_1 = arith.constant 0 : index
    %4 = vector.load %arg15[%c0, %c0_1] : memref<68x32xf32, #tpu.memory_space<vmem>>, vector<66x32xf32>
    %c1 = arith.constant 1 : index
    %c0_2 = arith.constant 0 : index
    %5 = vector.load %arg15[%c1, %c0_2] : memref<68x32xf32, #tpu.memory_space<vmem>>, vector<66x32xf32>
    %c2 = arith.constant 2 : index
    %c0_3 = arith.constant 0 : index
    %6 = vector.load %arg15[%c2, %c0_3] : memref<68x32xf32, #tpu.memory_space<vmem>>, vector<66x32xf32>
    %7 = tpu.concatenate %4, %5, %6 in 1 : vector<66x32xf32>, vector<66x32xf32>, vector<66x32xf32> -> vector<66x96xf32>
    %cst = arith.constant 0.000000e+00 : f32
    %8 = vector.broadcast %cst : f32 to vector<66x96xf32>
    %9 = arith.maximumf %7, %8 : vector<66x96xf32>
    %10 = arith.truncf %9 : vector<66x96xf32> to vector<66x96xbf16>
    %c0_4 = arith.constant 0 : index
    %c0_5 = arith.constant 0 : index
    %11 = vector.load %arg2[%c0_4, %c0_5] : memref<96x512xbf16, #tpu.memory_space<vmem>>, vector<96x512xbf16>
    %cst_6 = arith.constant dense<0.000000e+00> : vector<66x512xf32>
    %12 = tpu.matmul %10, %11, %cst_6 {dimension_numbers = #tpu.dot_dimension_numbers<[1], [0], [0], [1], [0, 0, 1, 1], [], []>} : vector<66x96xbf16>, vector<96x512xbf16>, vector<66x512xf32> -> vector<66x512xf32>
    %c0_7 = arith.constant 0 : index
    %c0_8 = arith.constant 0 : index
    %13 = vector.load %arg3[%c0_7, %c0_8] : memref<1x512xf32, #tpu.memory_space<vmem>>, vector<1x512xf32>
    %14 = vector.broadcast %13 : vector<1x512xf32> to vector<66x512xf32>
    %15 = arith.addf %12, %14 : vector<66x512xf32>
    %c1_i32 = arith.constant 1 : i32
    %16 = arith.subi %1, %c1_i32 : i32
    %17 = tpu.iota {dimensions = array<i32: 0>} : vector<66x1xi32>
    %18 = vector.broadcast %16 : i32 to vector<66x1xi32>
    %19 = arith.addi %18, %17 : vector<66x1xi32>
    %c0_i32_9 = arith.constant 0 : i32
    %20 = vector.broadcast %c0_i32_9 : i32 to vector<66x1xi32>
    %21 = arith.cmpi sge, %19, %20 : vector<66x1xi32>
    %c128_i32 = arith.constant 128 : i32
    %22 = vector.broadcast %c128_i32 : i32 to vector<66x1xi32>
    %23 = arith.cmpi slt, %19, %22 : vector<66x1xi32>
    %24 = arith.andi %21, %23 : vector<66x1xi1>
    %cst_10 = arith.constant 0.000000e+00 : f32
    %25 = vector.shape_cast %24 : vector<66x1xi1> to vector<66x1xi1>
    %26 = vector.broadcast %25 : vector<66x1xi1> to vector<66x512xi1>
    %27 = vector.broadcast %cst_10 : f32 to vector<66x512xf32>
    %28 = arith.select %26, %15, %27 : vector<66x512xi1>, vector<66x512xf32>
    %29 = arith.truncf %28 : vector<66x512xf32> to vector<66x512xbf16>
    %c0_11 = arith.constant 0 : index
    %c0_12 = arith.constant 0 : index
    %30 = vector.load %arg16[%c0_11, %c0_12] : memref<66x512xbf16, #tpu.memory_space<vmem>>, vector<66x512xbf16>
    tpu.vector_store %arg16[%c0_11, %c0_12], %29 {strides = array<i32>} : memref<66x512xbf16, #tpu.memory_space<vmem>>, vector<66x512xbf16>,
    %c0_13 = arith.constant 0 : index
    %c0_14 = arith.constant 0 : index
    %31 = vector.load %arg16[%c0_13, %c0_14] : memref<66x512xbf16, #tpu.memory_space<vmem>>, vector<64x512xbf16>
    %c0_15 = arith.constant 0 : index
    %c0_16 = arith.constant 0 : index
    %c0_17 = arith.constant 0 : index
    %32 = vector.load %arg4[%c0_15, %c0_16, %c0_17] : memref<3x512x256xbf16, #tpu.memory_space<vmem>>, vector<1x512x256xbf16>
    %33 = vector.shape_cast %32 : vector<1x512x256xbf16> to vector<512x256xbf16>
    %cst_18 = arith.constant dense<0.000000e+00> : vector<64x256xf32>
    %34 = tpu.matmul %31, %33, %cst_18 {dimension_numbers = #tpu.dot_dimension_numbers<[1], [0], [0], [1], [0, 0, 1, 1], [], []>} : vector<64x512xbf16>, vector<512x256xbf16>, vector<64x256xf32> -> vector<64x256xf32>
    %c1_19 = arith.constant 1 : index
    %c0_20 = arith.constant 0 : index
    %35 = vector.load %arg16[%c1_19, %c0_20] : memref<66x512xbf16, #tpu.memory_space<vmem>>, vector<64x512xbf16>
    %c1_21 = arith.constant 1 : index
    %c0_22 = arith.constant 0 : index
    %c0_23 = arith.constant 0 : index
    %36 = vector.load %arg4[%c1_21, %c0_22, %c0_23] : memref<3x512x256xbf16, #tpu.memory_space<vmem>>, vector<1x512x256xbf16>
    %37 = vector.shape_cast %36 : vector<1x512x256xbf16> to vector<512x256xbf16>
    %cst_24 = arith.constant dense<0.000000e+00> : vector<64x256xf32>
    %38 = tpu.matmul %35, %37, %cst_24 {dimension_numbers = #tpu.dot_dimension_numbers<[1], [0], [0], [1], [0, 0, 1, 1], [], []>} : vector<64x512xbf16>, vector<512x256xbf16>, vector<64x256xf32> -> vector<64x256xf32>
    %39 = arith.addf %34, %38 : vector<64x256xf32>
    %c2_25 = arith.constant 2 : index
    %c0_26 = arith.constant 0 : index
    %40 = vector.load %arg16[%c2_25, %c0_26] : memref<66x512xbf16, #tpu.memory_space<vmem>>, vector<64x512xbf16>
    %c2_27 = arith.constant 2 : index
    %c0_28 = arith.constant 0 : index
    %c0_29 = arith.constant 0 : index
    %41 = vector.load %arg4[%c2_27, %c0_28, %c0_29] : memref<3x512x256xbf16, #tpu.memory_space<vmem>>, vector<1x512x256xbf16>
    %42 = vector.shape_cast %41 : vector<1x512x256xbf16> to vector<512x256xbf16>
    %cst_30 = arith.constant dense<0.000000e+00> : vector<64x256xf32>
    %43 = tpu.matmul %40, %42, %cst_30 {dimension_numbers = #tpu.dot_dimension_numbers<[1], [0], [0], [1], [0, 0, 1, 1], [], []>} : vector<64x512xbf16>, vector<512x256xbf16>, vector<64x256xf32> -> vector<64x256xf32>
    %44 = arith.addf %39, %43 : vector<64x256xf32>
    %c0_31 = arith.constant 0 : index
    %c0_32 = arith.constant 0 : index
    %45 = vector.load %arg5[%c0_31, %c0_32] : memref<1x256xf32, #tpu.memory_space<vmem>>, vector<1x256xf32>
    %46 = vector.broadcast %45 : vector<1x256xf32> to vector<64x256xf32>
    %47 = arith.addf %44, %46 : vector<64x256xf32>
    %cst_33 = arith.constant 0.000000e+00 : f32
    %48 = vector.broadcast %cst_33 : f32 to vector<64x256xf32>
    %49 = arith.maximumf %47, %48 : vector<64x256xf32>
    %50 = arith.truncf %49 : vector<64x256xf32> to vector<64x256xbf16>
    %c0_34 = arith.constant 0 : index
    %c0_35 = arith.constant 0 : index
    %51 = vector.load %arg6[%c0_34, %c0_35] : memref<256x128xbf16, #tpu.memory_space<vmem>>, vector<256x128xbf16>
    %cst_36 = arith.constant dense<0.000000e+00> : vector<64x128xf32>
    %52 = tpu.matmul %50, %51, %cst_36 {dimension_numbers = #tpu.dot_dimension_numbers<[1], [0], [0], [1], [0, 0, 1, 1], [], []>} : vector<64x256xbf16>, vector<256x128xbf16>, vector<64x128xf32> -> vector<64x128xf32>
    %c0_37 = arith.constant 0 : index
    %c0_38 = arith.constant 0 : index
    %53 = vector.load %arg7[%c0_37, %c0_38] : memref<1x128xf32, #tpu.memory_space<vmem>>, vector<1x128xf32>
    %54 = vector.broadcast %53 : vector<1x128xf32> to vector<64x128xf32>
    %55 = arith.addf %52, %54 : vector<64x128xf32>
    %cst_39 = arith.constant 0.000000e+00 : f32
    %56 = vector.broadcast %cst_39 : f32 to vector<64x128xf32>
    %57 = arith.maximumf %55, %56 : vector<64x128xf32>
    %58 = arith.truncf %57 : vector<64x128xf32> to vector<64x128xbf16>
    %c0_40 = arith.constant 0 : index
    %c0_41 = arith.constant 0 : index
    %59 = vector.load %arg8[%c0_40, %c0_41] : memref<128x64xbf16, #tpu.memory_space<vmem>>, vector<128x64xbf16>
    %cst_42 = arith.constant dense<0.000000e+00> : vector<64x64xf32>
    %60 = tpu.matmul %58, %59, %cst_42 {dimension_numbers = #tpu.dot_dimension_numbers<[1], [0], [0], [1], [0, 0, 1, 1], [], []>} : vector<64x128xbf16>, vector<128x64xbf16>, vector<64x64xf32> -> vector<64x64xf32>
    %c0_43 = arith.constant 0 : index
    %c0_44 = arith.constant 0 : index
    %61 = vector.load %arg9[%c0_43, %c0_44] : memref<1x64xf32, #tpu.memory_space<vmem>>, vector<1x64xf32>
    %62 = vector.broadcast %61 : vector<1x64xf32> to vector<64x64xf32>
    %63 = arith.addf %60, %62 : vector<64x64xf32>
    %cst_45 = arith.constant 0.000000e+00 : f32
    %64 = vector.broadcast %cst_45 : f32 to vector<64x64xf32>
    %65 = arith.maximumf %63, %64 : vector<64x64xf32>
    %66 = arith.truncf %65 : vector<64x64xf32> to vector<64x64xbf16>
    %c0_46 = arith.constant 0 : index
    %c0_47 = arith.constant 0 : index
    %67 = vector.load %arg10[%c0_46, %c0_47] : memref<64x16xbf16, #tpu.memory_space<vmem>>, vector<64x16xbf16>
    %cst_48 = arith.constant dense<0.000000e+00> : vector<64x16xf32>
    %68 = tpu.matmul %66, %67, %cst_48 {dimension_numbers = #tpu.dot_dimension_numbers<[1], [0], [0], [1], [0, 0, 1, 1], [], []>} : vector<64x64xbf16>, vector<64x16xbf16>, vector<64x16xf32> -> vector<64x16xf32>
    %c0_49 = arith.constant 0 : index
    %c0_50 = arith.constant 0 : index
    %69 = vector.load %arg11[%c0_49, %c0_50] : memref<1x16xf32, #tpu.memory_space<vmem>>, vector<1x16xf32>
    %70 = vector.broadcast %69 : vector<1x16xf32> to vector<64x16xf32>
    %71 = arith.addf %68, %70 : vector<64x16xf32>
    %cst_51 = arith.constant 0.000000e+00 : f32
    %72 = vector.broadcast %cst_51 : f32 to vector<64x16xf32>
    %73 = arith.maximumf %71, %72 : vector<64x16xf32>
    %c0_52 = arith.constant 0 : index
    %c0_53 = arith.constant 0 : index
    %74 = vector.load %arg12[%c0_52, %c0_53] : memref<1x16xf32, #tpu.memory_space<vmem>>, vector<1x16xf32>
    %75 = vector.broadcast %74 : vector<1x16xf32> to vector<64x16xf32>
    %76 = arith.mulf %73, %75 : vector<64x16xf32>
    %cst_54 = arith.constant dense<0.000000e+00> : vector<64xf32>
    %77 = vector.multi_reduction <add>, %76, %cst_54 [1] : vector<64x16xf32> to vector<64xf32>
    %78 = vector.shape_cast %77 : vector<64xf32> to vector<64x1xf32>
    %c0_55 = arith.constant 0 : index
    %c0_56 = arith.constant 0 : index
    %79 = vector.load %arg13[%c0_55, %c0_56] : memref<1x1xf32, #tpu.memory_space<vmem>>, vector<1x1xf32>
    %80 = vector.broadcast %79 : vector<1x1xf32> to vector<64x1xf32>
    %81 = arith.addf %78, %80 : vector<64x1xf32>
    %82 = arith.negf %81 : vector<64x1xf32>
    %83 = math.exp %82 : vector<64x1xf32>
    %cst_57 = arith.constant 1.000000e+00 : f32
    %84 = vector.broadcast %cst_57 : f32 to vector<64x1xf32>
    %85 = arith.addf %84, %83 : vector<64x1xf32>
    %86 = arith.divf %84, %85 : vector<64x1xf32>
    %c0_58 = arith.constant 0 : index
    %c0_59 = arith.constant 0 : index
    %87 = vector.load %arg14[%c0_58, %c0_59] : memref<64x1xf32, #tpu.memory_space<vmem>>, vector<64x1xf32>
    tpu.vector_store %arg14[%c0_58, %c0_59], %86 {strides = array<i32>} : memref<64x1xf32, #tpu.memory_space<vmem>>, vector<64x1xf32>,
    return
  }
  func.func @transform_1(%arg0: i32) -> (i32, i32) {
    %c0_i32 = arith.constant 0 : i32
    %c0_i32_0 = arith.constant 0 : i32
    %c0_i32_1 = arith.constant 0 : i32
    return %c0_i32, %c0_i32_0 : i32, i32
  }
  func.func @transform_2(%arg0: i32) -> (i32, i32) {
    %c0_i32 = arith.constant 0 : i32
    %c0_i32_0 = arith.constant 0 : i32
    %c0_i32_1 = arith.constant 0 : i32
    return %c0_i32, %c0_i32_0 : i32, i32
  }
  func.func @transform_3(%arg0: i32) -> (i32, i32, i32) {
    %c0_i32 = arith.constant 0 : i32
    %c0_i32_0 = arith.constant 0 : i32
    %c0_i32_1 = arith.constant 0 : i32
    %c0_i32_2 = arith.constant 0 : i32
    return %c0_i32, %c0_i32_0, %c0_i32_1 : i32, i32, i32
  }
  func.func @transform_4(%arg0: i32) -> (i32, i32) {
    %c0_i32 = arith.constant 0 : i32
    %c0_i32_0 = arith.constant 0 : i32
    %c0_i32_1 = arith.constant 0 : i32
    return %c0_i32, %c0_i32_0 : i32, i32
  }
  func.func @transform_5(%arg0: i32) -> (i32, i32) {
    %c0_i32 = arith.constant 0 : i32
    %c0_i32_0 = arith.constant 0 : i32
    %c0_i32_1 = arith.constant 0 : i32
    return %c0_i32, %c0_i32_0 : i32, i32
  }
  func.func @transform_6(%arg0: i32) -> (i32, i32) {
    %c0_i32 = arith.constant 0 : i32
    %c0_i32_0 = arith.constant 0 : i32
    %c0_i32_1 = arith.constant 0 : i32
    return %c0_i32, %c0_i32_0 : i32, i32
  }
  func.func @transform_7(%arg0: i32) -> (i32, i32) {
    %c0_i32 = arith.constant 0 : i32
    %c0_i32_0 = arith.constant 0 : i32
    %c0_i32_1 = arith.constant 0 : i32
    return %c0_i32, %c0_i32_0 : i32, i32
  }
  func.func @transform_8(%arg0: i32) -> (i32, i32) {
    %c0_i32 = arith.constant 0 : i32
    %c0_i32_0 = arith.constant 0 : i32
    %c0_i32_1 = arith.constant 0 : i32
    return %c0_i32, %c0_i32_0 : i32, i32
  }
  func.func @transform_9(%arg0: i32) -> (i32, i32) {
    %c0_i32 = arith.constant 0 : i32
    %c0_i32_0 = arith.constant 0 : i32
    %c0_i32_1 = arith.constant 0 : i32
    return %c0_i32, %c0_i32_0 : i32, i32
  }
  func.func @transform_10(%arg0: i32) -> (i32, i32) {
    %c0_i32 = arith.constant 0 : i32
    %c0_i32_0 = arith.constant 0 : i32
    %c0_i32_1 = arith.constant 0 : i32
    return %c0_i32, %c0_i32_0 : i32, i32
  }
  func.func @transform_11(%arg0: i32) -> (i32, i32) {
    %c0_i32 = arith.constant 0 : i32
    %c0_i32_0 = arith.constant 0 : i32
    %c0_i32_1 = arith.constant 0 : i32
    return %c0_i32, %c0_i32_0 : i32, i32
  }
  func.func @transform_12(%arg0: i32) -> (i32, i32) {
    %c0_i32 = arith.constant 0 : i32
    %c0_i32_0 = arith.constant 0 : i32
    %c0_i32_1 = arith.constant 0 : i32
    return %c0_i32, %c0_i32_0 : i32, i32
  }
  func.func @transform_13(%arg0: i32) -> (i32, i32) {
    %c0_i32 = arith.constant 0 : i32
    %c0_i32_0 = arith.constant 0 : i32
    return %arg0, %c0_i32 : i32, i32
  }
}

</mosaic_0001>

<bundles_post_ra>
// kernel: tpu_custom_call.1
= control target key start
LH: loop header
LB: loop body
LE: loop exit
PB: predicated region body
PF: predicated region fallthrough
CT: control target
= control target key end

     0   :  { %s6134_s0 = inlined_call_operand.vmem [shape: f32[132,32], index: 0, kind: input, shape index: {}]   ;;  %s6135_s1 = inlined_call_operand.vmem [shape: bf16[96,512], index: 1, kind: input, shape index: {}]   ;;  %s6136_s2 = inlined_call_operand.hbm [shape: f32[1,512], index: 2, kind: input, shape index: {}]   ;;  %s6137_s3 = inlined_call_operand.hbm [shape: bf16[3,512,256], index: 3, kind: input, shape index: {}]   ;;  %s6138_s4 = inlined_call_operand.vmem [shape: f32[1,256], index: 4, kind: input, shape index: {}]   ;;  %s6139_s5 = inlined_call_operand.vmem [shape: bf16[256,128], index: 5, kind: input, shape index: {}]   ;;  %s6140_s6 = inlined_call_operand.hbm [shape: f32[1,128], index: 6, kind: input, shape index: {}]   ;;  %s6141_s7 = inlined_call_operand.vmem [shape: bf16[128,64], index: 7, kind: input, shape index: {}]   ;;  %s6142_s8 = inlined_call_operand.vmem [shape: f32[1,64], index: 8, kind: input, shape index: {}]   ;;  %s6143_s9 = inlined_call_operand.vmem [shape: bf16[64,16], index: 9, kind: input, shape index: {}]   ;;  %s6144_s10 = inlined_call_operand.vmem [shape: f32[1,16], index: 10, kind: input, shape index: {}]   ;;  %s6145_s11 = inlined_call_operand.vmem [shape: f32[1,16], index: 11, kind: input, shape index: {}]   ;;  %s6146_s12 = inlined_call_operand.<no memory space> [shape: f32[1,1], index: 12, kind: input, shape index: {}]   ;;  %s6147_s13 = inlined_call_operand.vmem [shape: f32[128,1], index: 13, kind: output, shape index: {}]  }
   0x1   :  { %v18_v0 = vstv %s6146_s12 }
   0x2   :  { %19 = vst [vmem:[#allocation5] sm:$0x1] %v18_v0 }
   0x3   :  { %20 = vsyncpa [#allocation7], 0 }
   0x4   :  { %21 = vsyncpa [#allocation9], 0  ;;  %s5156_s27 = smov 0  }
   0x5 LB: > { %6151 = sst [smem:[#allocation15_spill]] %s5073_s27  ;;  %s5075_s28 = smov [#allocation8]   ;;  %s5073_s27 = sphi %s5156_s27, %s27_s27  }
   0x6   : > { %s336_s29 = sshll.u32 %s5075_s28, 4  ;;  %s5162_s30 = sadd.s32 4294967295, %s5073_s27   ;;  %s5171_s29 = int_to_ptr.vmem [resolvable:$true] %s336_s29 }
   0x7   : > { %p3910_p0 = scmp.ge.s32.totalorder %s5073_s27, 1  ;;  %p310_p1 = scmp.lt.s32.totalorder %s5073_s27, 3 }
   0x8   : > { %p4459_p2 = scmp.eq.s32.totalorder %s5162_s30, 0  ;;  %s5076_s14 = smov [#allocation6]  }
   0x9   : > { %p5167_p3 = pnand %p3910_p0, %p310_p1  ;;  %s326_s15 = sshll.u32 %s5076_s14, 4  ;;  %s5181_s15 = int_to_ptr.vmem [resolvable:$true] %s326_s15 }
   0xa   : > { %s5077_s17 = smov [#allocation10]   ;;  %s4973_s21 = scalar_lea.hbm %s6137_s3, 24576 }
   0xb   : > { %p4449_p4 = pneg %p5167_p3  ;;  %s356_s18 = sshll.u32 %s5077_s17, 4  ;;  %s5183_s18 = int_to_ptr.vmem [resolvable:$true] %s356_s18 }
   0xc   : > { %p4974_p6 = scmp.ne.s32.totalorder %s6137_s3, %s4973_s21  ;;  %p4980_p10 = scmp.lt.u32.totalorder %s4973_s21, %s6137_s3 }
   0xd   : > { %p5177_p5 = pnand %p4459_p2, %p4449_p4 }
   0xf   : > { %p5193_p7 = pneg %p5177_p5 }
  0x11   : > { %p4976_p8 = pnand %p5193_p7, %p4974_p6 }
  0x13   : > { %p4977_p9 = pneg %p4976_p8 }
  0x15   : > { %p4982_p11 = pnand %p4980_p10, %p4977_p9 }
  0x17   : > { %4985 = shalt.err (!%p4982_p11)
}
  0x18   : > { %s4986_s28 = scalar_lea.vmem %s5171_s29, 24576  ;;  %p4994_p1 = scmp.lt.s32.totalorder %s5171_s29, %s5171_s29 }
  0x19   : > { %p4987_p12 = scmp.ne.s32.totalorder %s5171_s29, %s4986_s28  ;;  %p4995_p4 = scmp.lt.s32.totalorder %s4986_s28, %s4986_s28 }
  0x1b   : > { %p4989_p13 = pnand %p4987_p12, %p5193_p7  ;;  %p4996_p6 = por %p4995_p4, %p4994_p1 }
  0x1d   : > { %p4990_p0 = pneg %p4989_p13 }
  0x1f   : > { %p4997_p8 = pnand %p4996_p6, %p4990_p0 }
  0x21   : > { %5000 = shalt.err (!%p4997_p8)
}
  0x22   : > { %s5078_s14 = smov 128   ;;  %s5079_s17 = smov 8  }
  0x23   : > { %4455 = dma.hbm_to_vmem [thread:$0]  (!%p5177_p5), %s6137_s3, 24576, %s5171_s29, [#allocation9], %s5078_s14, %s5078_s14, %s5079_s17  }
  0x24   : > { %s5001_s23 = scalar_lea.hbm %s6136_s2, 64 }
  0x25   : > { %p5002_p9 = scmp.ne.s32.totalorder %s6136_s2, %s5001_s23  ;;  %p5008_p12 = scmp.lt.u32.totalorder %s5001_s23, %s6136_s2 }
  0x27   : > { %p5004_p10 = pnand %p5002_p9, %p5193_p7 }
  0x29   : > { %p5005_p11 = pneg %p5004_p10 }
  0x2b   : > { %p5010_p13 = pnand %p5008_p12, %p5005_p11 }
  0x2d   : > { %5013 = shalt.err (!%p5010_p13)
}
  0x2e   : > { %s5014_s29 = scalar_lea.vmem %s5181_s15, 64  ;;  %p5022_p6 = scmp.lt.s32.totalorder %s5181_s15, %s5181_s15 }
  0x2f   : > { %p5015_p0 = scmp.ne.s32.totalorder %s5181_s15, %s5014_s29  ;;  %p5023_p8 = scmp.lt.s32.totalorder %s5014_s29, %s5014_s29 }
  0x31   : > { %p5017_p1 = pnand %p5015_p0, %p5193_p7  ;;  %p5024_p9 = por %p5023_p8, %p5022_p6 }
  0x33   : > { %p5018_p4 = pneg %p5017_p1 }
  0x35   : > { %p5025_p10 = pnand %p5024_p9, %p5018_p4 }
  0x37   : > { %5028 = shalt.err (!%p5025_p10)
}
  0x38   : > { %4452 = dma.hbm_to_vmem [thread:$0]  (!%p5177_p5), %s6136_s2, 64, %s5181_s15, [#allocation7]  }
  0x39   : > { %s5029_s20 = scalar_lea.hbm %s6140_s6, 16 }
  0x3a   : > { %p5030_p11 = scmp.ne.s32.totalorder %s6140_s6, %s5029_s20  ;;  %p5036_p0 = scmp.lt.u32.totalorder %s5029_s20, %s6140_s6 }
  0x3c   : > { %p5032_p12 = pnand %p5030_p11, %p5193_p7 }
  0x3e   : > { %p5033_p13 = pneg %p5032_p12 }
  0x40   : > { %p5038_p1 = pnand %p5036_p0, %p5033_p13 }
  0x42   : > { %5041 = shalt.err (!%p5038_p1)
}
  0x43   : > { %s5042_s15 = scalar_lea.vmem %s5183_s18, 16  ;;  %s5049_s26 = scalar_lea.vmem %s5183_s18, 32 }
  0x44   : > { %p5043_p4 = scmp.ne.s32.totalorder %s5183_s18, %s5042_s15  ;;  %p5050_p9 = scmp.lt.s32.totalorder %s5183_s18, %s5183_s18 }
  0x45   : > { %p5051_p10 = scmp.lt.s32.totalorder %s5049_s26, %s5042_s15 }
  0x46   : > { %p5045_p6 = pnand %p5043_p4, %p5193_p7 }
  0x47   : > { %p5052_p11 = por %p5051_p10, %p5050_p9 }
  0x48   : > { %p5046_p8 = pneg %p5045_p6 }
  0x4a   : > { %p5053_p12 = pnand %p5052_p11, %p5046_p8 }
  0x4c   : > { %5056 = shalt.err (!%p5053_p12)
}
  0x4d   : > { %4458 = dma.hbm_to_vmem [thread:$0]  (!%p5177_p5), %s6140_s6, 16, %s5183_s18, [#allocation9]  }
  0x4e   : > { %387 = sbr.rel (%p5167_p3) target bundleno = 1730 (0x6c2), region = 68 }
  0x55   : > { %5062 = dma.done.wait (%p4459_p2), [#allocation7], 64  }
  0x56   : > { %5064 = vsyncadd (%p4459_p2), [#allocation7], 4294967232 }
  0x57   : > { %5066 = dma.done.wait (%p4459_p2), [#allocation9], 24592  }
  0x58   : > { %5068 = vsyncadd (%p4459_p2), [#allocation9], 4294942704  ;;  %s3918_s16 = sshll.u32 %s5162_s30, 3  ;;  %s3920_s18 = sshll.u32 %s5162_s30, 6 }
  0x59   : > { %p433_p5 = scmp.lt.s32.totalorder %s3918_s16, 15  ;;  %s440_s27 = scalar_lea.vmem %s6134_s0, %s3920_s18 }
  0x5a   : > { %v478_v1 = vld [vmem:[%s440_s27] sm:$0xff]  ;;  %v480_v2 = vld [vmem:[%s440_s27 + $0x8] sm:$0xff]  ;;  %v482_v3 = vld [vmem:[%s440_s27 + $0x10] sm:$0xff] }
  0x5b   : > { %s6188_s16 = smov (!%p433_p5, %s3918_s16), 15  ;;  %479 = vst [vmem:[#allocation2] sm:$0xff] %v478_v1  ;;  %481 = vst [vmem:[#allocation2 + $0x8] sm:$0xff] %v480_v2  ;;  %v484_v4 = vld [vmem:[%s440_s27 + $0x18] sm:$0xff]  ;;  %v486_v5 = vld [vmem:[%s440_s27 + $0x20] sm:$0xff] }
  0x5c   : > { %s3919_s14 = sshll.u32 %s6188_s16, 3  ;;  %483 = vst [vmem:[#allocation2 + $0x10] sm:$0xff] %v482_v3  ;;  %v488_v6 = vld [vmem:[%s440_s27 + $0x28] sm:$0xff]  ;;  %485 = vst [vmem:[#allocation2 + $0x18] sm:$0xff] %v484_v4  ;;  %v490_v7 = vld [vmem:[%s440_s27 + $0x30] sm:$0xff] }
  0x5d   : > { %s5281_s20 = scalar_lea.vmem %s6147_s13, %s3919_s14  ;;  %487 = vst [vmem:[#allocation2 + $0x20] sm:$0xff] %v486_v5  ;;  %489 = vst [vmem:[#allocation2 + $0x28] sm:$0xff] %v488_v6  ;;  %v492_v8 = vld [vmem:[%s440_s27 + $0x38] sm:$0xff]  ;;  %v3921_v9 = vld [vmem:[%s440_s27 + $0x40] sm:$0xf] }
  0x5e   : > { %491 = vst [vmem:[#allocation2 + $0x30] sm:$0xff] %v490_v7  ;;  %493 = vst [vmem:[#allocation2 + $0x38] sm:$0xff] %v492_v8 }
  0x5f   : > { %504 = vst [vmem:[#allocation2 + $0x40] sm:$0xf] %v3921_v9 }
  0x60   : > { %508 = vsyncadd [#allocation4], 1088 }
  0x61   : > { %5069 = dma.done.wait [#allocation4], 1088 }
  0x62   : > { %5070 = vsyncadd [#allocation4], 4294966208  ;;  %v5080_v10 = vmov 0   ;;  %v521_v11 = vld [vmem:[#allocation2 + $0x1] sm:$0xff]  ;;  %s5081_s21 = smov 32   ;;  %s5082_s25 = smov 64  }
  0x63   : > { %859 = vmatprep.mubr.bf16.mxu1 %v5080_v10  ;;  %v522_v12 = vld [vmem:[#allocation2 + $0x9] sm:$0xff]  ;;  %v523_v16 = vld [vmem:[#allocation2 + $0x11] sm:$0xff]  ;;  %v4559_v51 = vld [vmem:[#allocation8] ss:$8 sps:$4 sm:$0xff]   ;;  %vm611_vm0 = vcmask 261120   ;;  %vm6149_vm1 = vcmask 523264  }
  0x64   : > { %v530_v13 = vld [vmem:[#allocation2 + $0x2] sm:$0xff]  ;;  %v4481_v14 = vpack.i.bf16 %v522_v12, %v521_v11  ;;  %v531_v15 = vld [vmem:[#allocation2 + $0xa] sm:$0xff]  ;;  %v524_v17 = vld [vmem:[#allocation2 + $0x19] sm:$0xff]  ;;  %vm811_vm2 = vcmask 785408   ;;  %s3956_s29 = sadd.s32 4294967295, %s3920_s18 }
  0x65   : > { %v4491_v18 = vpack.i.bf16 %v524_v17, %v523_v16  ;;  %v532_v19 = vld [vmem:[#allocation2 + $0x12] sm:$0xff]  ;;  %v533_v20 = vld [vmem:[#allocation2 + $0x1a] sm:$0xff]  ;;  %v4486_v21 = vpack.i.bf16 %v531_v15, %v530_v13  ;;  %v526_v24 = vld [vmem:[#allocation2 + $0x29] sm:$0xff] }
  0x66   : > { %4482 = vrot.lane.b32.xlu0 %v4481_v14, %s5081_s21  ;;  %v4496_v22 = vpack.i.bf16 %v533_v20, %v532_v19  ;;  %v525_v23 = vld [vmem:[#allocation2 + $0x21] sm:$0xff]  ;;  %v535_v26 = vld [vmem:[#allocation2 + $0x2a] sm:$0xff]  ;;  %v528_v28 = vld [vmem:[#allocation2 + $0x39] sm:$0xff] }
  0x67   : > { %4492 = vrot.lane.b32.xlu1 %v4491_v18, %s5081_s21  ;;  %v534_v25 = vld [vmem:[#allocation2 + $0x22] sm:$0xff]  ;;  %v527_v27 = vld [vmem:[#allocation2 + $0x31] sm:$0xff]  ;;  %v4501_v30 = vpack.i.bf16 %v526_v24, %v525_v23  ;;  %v537_v35 = vld [vmem:[#allocation2 + $0x3a] sm:$0xff] }
  0x68   : > { %v4521_v29 = vld [vmem:[%s6135_s1 + $0x4] ss:$16 sps:$4 sm:$0xff]   ;;  %v4523_v31 = vld [vmem:[%s6135_s1] ss:$16 sps:$4 sm:$0xff]   ;;  %v4506_v32 = vpack.i.bf16 %v535_v26, %v534_v25  ;;  %v4511_v38 = vpack.i.bf16 %v528_v28, %v527_v27  ;;  %v4541_v49 = vld [vmem:[%s6135_s1 + $0xc] ss:$16 sps:$4 sm:$0xff]  }
  0x69   : > { %v536_v33 = vld [vmem:[#allocation2 + $0x32] sm:$0xff]  ;;  %827 = vmatprep.subr.bf16.mxu1 %v4521_v29  ;;  %v529_v42 = vld [vmem:[#allocation2 + $0x41] sm:$0x3]  ;;  %v4565_v55 = vld [vmem:[#allocation8 + $0x20] ss:$8 sps:$4 sm:$0xff]  }
  0x6a   : > { %4487 = vrot.lane.b32.xlu0 %v4486_v21, %s5082_s25  ;;  %v4524_v34 = vld [vmem:[%s6135_s1 + $0x24] ss:$16 sps:$4 sm:$0xff]   ;;  %828 = vmatpush1.bf16.msra.mxu1 %v4523_v31  ;;  %v4526_v36 = vld [vmem:[%s6135_s1 + $0x20] ss:$16 sps:$4 sm:$0xff]   ;;  %v4516_v39 = vpack.i.bf16 %v537_v35, %v536_v33  ;;  %v513_v12 = vld [vmem:[#allocation2 + $0x8] sm:$0xff] }
  0x6b   : > { %4497 = vrot.lane.b32.xlu1 %v4496_v22, %s5082_s25  ;;  %829 = vmatprep.subr.bf16.mxu1 %v4524_v34  ;;  %v4527_v37 = vld [vmem:[%s6135_s1 + $0x44] ss:$16 sps:$4 sm:$0xff]   ;;  %v4529_v40 = vld [vmem:[%s6135_s1 + $0x40] ss:$16 sps:$4 sm:$0xff]   ;;  %v515_v17 = vld [vmem:[#allocation2 + $0x18] sm:$0xff] }
  0x6c   : > { %v4530_v41 = vld [vmem:[%s6135_s1 + $0x64] ss:$16 sps:$4 sm:$0xff]   ;;  %v538_v43 = vld [vmem:[#allocation2 + $0x42] sm:$0x3] }
  0x6d   : > { %v4532_v44 = vld [vmem:[%s6135_s1 + $0x60] ss:$16 sps:$4 sm:$0xff]   ;;  %v4533_v45 = vld [vmem:[%s6135_s1 + $0x84] ss:$16 sps:$4 sm:$0xff]  }
  0x6e   : > { %4502 = vrot.lane.b32.xlu0 %v4501_v30, %s5081_s21  ;;  %830 = vmatpush1.bf16.msra.mxu1 %v4526_v36  ;;  %v4535_v46 = vld [vmem:[%s6135_s1 + $0x80] ss:$16 sps:$4 sm:$0xff]   ;;  %v4536_v47 = vld [vmem:[%s6135_s1 + $0xa4] ss:$16 sps:$4 sm:$0xff]  }
  0x6f   : > { %4507 = vrot.lane.b32.xlu1 %v4506_v32, %s5082_s25  ;;  %831 = vmatprep.subr.bf16.mxu1 %v4527_v37  ;;  %v4538_v48 = vld [vmem:[%s6135_s1 + $0xa0] ss:$16 sps:$4 sm:$0xff]   ;;  %v4539_v37 = vld [vmem:[%s6135_s1 + $0x8] ss:$16 sps:$4 sm:$0xff]  }
  0x70   : > { %v4557_v50 = vld [vmem:[#allocation8 + $0x4] ss:$8 sps:$4 sm:$0xff]   ;;  %v4560_v52 = vld [vmem:[#allocation8 + $0x14] ss:$8 sps:$4 sm:$0xff]   ;;  %v4562_v53 = vld [vmem:[#allocation8 + $0x10] ss:$8 sps:$4 sm:$0xff]  }
  0x71   : > { %2405 = vmatprep.subr.bf16.mxu0 %v4557_v50  ;;  %v4563_v54 = vld [vmem:[#allocation8 + $0x24] ss:$8 sps:$4 sm:$0xff]   ;;  %v4566_v56 = vld [vmem:[#allocation8 + $0x34] ss:$8 sps:$4 sm:$0xff]   ;;  %v4571_v57 = vld [vmem:[#allocation8 + $0x30] ss:$8 sps:$4 sm:$0xff]  }
  0x72   : > { %4512 = vrot.lane.b32.xlu0 %v4511_v38, %s5081_s21  ;;  %832 = vmatpush1.bf16.msra.mxu1 %v4529_v40  ;;  %v4572_v58 = vld [vmem:[#allocation8 + $0x44] ss:$8 sps:$4 sm:$0xff]   ;;  %v4577_v59 = vld [vmem:[#allocation8 + $0x40] ss:$8 sps:$4 sm:$0xff]   ;;  %v4578_v60 = vld [vmem:[#allocation8 + $0x54] ss:$8 sps:$4 sm:$0xff]  }
  0x73   : > { %4517 = vrot.lane.b32.xlu1 %v4516_v39, %s5082_s25  ;;  %833 = vmatprep.subr.bf16.mxu1 %v4530_v41  ;;  %v4583_v61 = vld [vmem:[#allocation8 + $0x50] ss:$8 sps:$4 sm:$0xff]   ;;  %v4584_v62 = vld [vmem:[#allocation8 + $0x64] ss:$8 sps:$4 sm:$0xff]   ;;  %v4589_v63 = vld [vmem:[#allocation8 + $0x60] ss:$8 sps:$4 sm:$0xff]  }
  0x74   : > { %2406 = vmatpush1.bf16.msra.mxu0 %v4559_v51  ;;  %v4590_v0 = vld [vmem:[#allocation8 + $0x74] ss:$8 sps:$4 sm:$0xff]   ;;  %v4595_v1 = vld [vmem:[#allocation8 + $0x70] ss:$8 sps:$4 sm:$0xff]   ;;  %v4596_v2 = vld [vmem:[#allocation8 + $0x84] ss:$8 sps:$4 sm:$0xff]  }
  0x75   : > { %2407 = vmatprep.subr.bf16.mxu0 %v4560_v52  ;;  %v4601_v3 = vld [vmem:[#allocation8 + $0x80] ss:$8 sps:$4 sm:$0xff]   ;;  %v4602_v4 = vld [vmem:[#allocation8 + $0x94] ss:$8 sps:$4 sm:$0xff]   ;;  %v4607_v5 = vld [vmem:[#allocation8 + $0x90] ss:$8 sps:$4 sm:$0xff]  }
  0x76   : > { %564 = vrot.lane.b32.xlu0 %v529_v42, %s5081_s21  ;;  %834 = vmatpush1.bf16.msra.mxu1 %v4532_v44  ;;  %v4608_v6 = vld [vmem:[#allocation8 + $0xa4] ss:$8 sps:$4 sm:$0xff]   ;;  %v4613_v7 = vld [vmem:[#allocation8 + $0xa0] ss:$8 sps:$4 sm:$0xff]   ;;  %v4614_v8 = vld [vmem:[#allocation8 + $0xb4] ss:$8 sps:$4 sm:$0xff]  }
  0x77   : > { %600 = vrot.lane.b32.xlu1 %v538_v43, %s5082_s25  ;;  %835 = vmatprep.subr.bf16.mxu1 %v4533_v45  ;;  %v512_v11 = vld [vmem:[#allocation2] sm:$0xff]  ;;  %v514_v16 = vld [vmem:[#allocation2 + $0x10] sm:$0xff]  ;;  %v4544_v42 = vld [vmem:[%s6135_s1 + $0x2c] ss:$16 sps:$4 sm:$0xff]  }
  0x78   : > { %2408 = vmatpush1.bf16.msra.mxu0 %v4562_v53  ;;  %v516_v43 = vld [vmem:[#allocation2 + $0x20] sm:$0xff]  ;;  %v517_v44 = vld [vmem:[#allocation2 + $0x28] sm:$0xff] }
  0x79   : > { %2409 = vmatprep.subr.bf16.mxu0 %v4563_v54  ;;  %v4547_v52 = vld [vmem:[%s6135_s1 + $0x4c] ss:$16 sps:$4 sm:$0xff]  }
  0x7a   : > { %836 = vmatpush1.bf16.msra.mxu1 %v4535_v46 }
  0x7b   : > { %837 = vmatprep.subr.bf16.mxu1 %v4536_v47 }
  0x7c   : > { %2410 = vmatpush1.bf16.msra.mxu0 %v4565_v55 }
  0x7d   : > { %2411 = vmatprep.subr.bf16.mxu0 %v4566_v56 }
  0x7e   : > { %838 = vmatpush1.bf16.msra.mxu1 %v4538_v48 }
  0x7f   : > { %908 = vmatprep.subr.bf16.mxu1 %v4541_v49  ;;  %v4542_v49 = vld [vmem:[%s6135_s1 + $0x28] ss:$16 sps:$4 sm:$0xff]  }
  0x80   : > { %2412 = vmatpush1.bf16.msra.mxu0 %v4571_v57  ;;  %v4545_v57 = vld [vmem:[%s6135_s1 + $0x48] ss:$16 sps:$4 sm:$0xff]  }
  0x81   : > { %2413 = vmatprep.subr.bf16.mxu0 %v4572_v58 }
  0x84   : > { %2414 = vmatpush1.bf16.msra.mxu0 %v4577_v59 }
  0x85   : > { %2415 = vmatprep.subr.bf16.mxu0 %v4578_v60 }
  0x88   : > { %2416 = vmatpush1.bf16.msra.mxu0 %v4583_v61  ;;  %v4550_v61 = vld [vmem:[%s6135_s1 + $0x6c] ss:$16 sps:$4 sm:$0xff]  }
  0x89   : > { %2417 = vmatprep.subr.bf16.mxu0 %v4584_v62  ;;  %v518_v62 = vld [vmem:[#allocation2 + $0x30] sm:$0xff] }
  0x8c   : > { %2418 = vmatpush1.bf16.msra.mxu0 %v4589_v63  ;;  %v519_v63 = vld [vmem:[#allocation2 + $0x38] sm:$0xff] }
  0x8d   : > { %2419 = vmatprep.subr.bf16.mxu0 %v4590_v0 }
  0x90   : > { %2420 = vmatpush1.bf16.msra.mxu0 %v4595_v1 }
  0x91   : > { %2421 = vmatprep.subr.bf16.mxu0 %v4596_v2 }
  0x94   : > { %2422 = vmatpush1.bf16.msra.mxu0 %v4601_v3 }
  0x95   : > { %2423 = vmatprep.subr.bf16.mxu0 %v4602_v4  ;;  %v4548_v4 = vld [vmem:[%s6135_s1 + $0x68] ss:$16 sps:$4 sm:$0xff]  }
  0x98   : > { %2424 = vmatpush1.bf16.msra.mxu0 %v4607_v5 }
  0x99   : > { %2425 = vmatprep.subr.bf16.mxu0 %v4608_v6 }
  0x9c   : > { %2426 = vmatpush1.bf16.msra.mxu0 %v4613_v7  ;;  %v4553_v7 = vld [vmem:[%s6135_s1 + $0x8c] ss:$16 sps:$4 sm:$0xff]  }
  0x9d   : > { %2427 = vmatprep.subr.bf16.mxu0 %v4614_v8 }
  0xd8   : > { %v4483_v9 = vpop.permute.xlu0 %4482 }
  0xd9   : > { %v4485_v13 = vunpack.i.h.bf16 %v4483_v9  ;;  %v4484_v14 = vunpack.i.l.bf16 %v4483_v9  ;;  %v4493_v15 = vpop.permute.xlu1 %4492 }
  0xda   : > { %v4495_v18 = vunpack.i.h.bf16 %v4493_v15  ;;  %v4494_v19 = vunpack.i.l.bf16 %v4493_v15  ;;  %v520_v15 = vld [vmem:[#allocation2 + $0x40] sm:$0x3] }
  0xdb   : > { %v612_v21 = vsel %vm611_vm0, %v512_v11, %v4484_v14  ;;  %v613_v22 = vsel %vm611_vm0, %v513_v12, %v4485_v13  ;;  %v4551_v12 = vld [vmem:[%s6135_s1 + $0x88] ss:$16 sps:$4 sm:$0xff]   ;;  %v4556_v13 = vld [vmem:[%s6135_s1 + $0xac] ss:$16 sps:$4 sm:$0xff]  }
  0xdc   : > { %v4488_v20 = vpop.permute.xlu0 %4487  ;;  %v614_v26 = vsel %vm611_vm0, %v514_v16, %v4494_v19  ;;  %v615_v27 = vsel %vm611_vm0, %v515_v17, %v4495_v18  ;;  %v4554_v18 = vld [vmem:[%s6135_s1 + $0xa8] ss:$16 sps:$4 sm:$0xff]  }
  0xdd   : > { %v4490_v23 = vunpack.i.h.bf16 %v4488_v20  ;;  %v4489_v24 = vunpack.i.l.bf16 %v4488_v20  ;;  %v4498_v25 = vpop.permute.xlu1 %4497 }
  0xde   : > { %v4500_v28 = vunpack.i.h.bf16 %v4498_v25  ;;  %v4499_v29 = vunpack.i.l.bf16 %v4498_v25 }
  0xdf   : > { %v622_v30 = vsel %vm6149_vm1, %v612_v21, %v4489_v24  ;;  %v623_v31 = vsel %vm6149_vm1, %v613_v22, %v4490_v23  ;;  %v4570_v21 = vld [vmem:[#allocation8 + $0x204] ss:$8 sps:$4 sm:$0xff]  }
  0xe0   : > { %v631_v32 = vmax.f32 %v622_v30, 0.0  ;;  %v632_v33 = vmax.f32 %v623_v31, 0.0  ;;  %v4503_v34 = vpop.permute.xlu0 %4502  ;;  %v624_v35 = vsel %vm6149_vm1, %v614_v26, %v4499_v29  ;;  %v625_v36 = vsel %vm6149_vm1, %v615_v27, %v4500_v28  ;;  %v4568_v26 = vld [vmem:[#allocation8 + $0x200] ss:$8 sps:$4 sm:$0xff]   ;;  %v4576_v27 = vld [vmem:[#allocation8 + $0x214] ss:$8 sps:$4 sm:$0xff]  }
  0xe1   : > { %v4505_v39 = vunpack.i.h.bf16 %v4503_v34  ;;  %v4504_v40 = vunpack.i.l.bf16 %v4503_v34  ;;  %v4508_v41 = vpop.permute.xlu1 %4507  ;;  %v633_v45 = vmax.f32 %v624_v35, 0.0  ;;  %v634_v46 = vmax.f32 %v625_v36, 0.0  ;;  %v4574_v28 = vld [vmem:[#allocation8 + $0x210] ss:$8 sps:$4 sm:$0xff]   ;;  %v4582_v29 = vld [vmem:[#allocation8 + $0x224] ss:$8 sps:$4 sm:$0xff]  }
  0xe2   : > { %v5344_v38 = vpack.c.bf16 %v632_v33, %v631_v32  ;;  %v4510_v47 = vunpack.i.h.bf16 %v4508_v41  ;;  %v4509_v48 = vunpack.i.l.bf16 %v4508_v41  ;;  %v4580_v30 = vld [vmem:[#allocation8 + $0x220] ss:$8 sps:$4 sm:$0xff]   ;;  %v4588_v31 = vld [vmem:[#allocation8 + $0x234] ss:$8 sps:$4 sm:$0xff]   ;;  %v4586_v32 = vld [vmem:[#allocation8 + $0x230] ss:$8 sps:$4 sm:$0xff]  }
  0xe3   : > { %v616_v50 = vsel %vm611_vm0, %v516_v43, %v4504_v40  ;;  %v617_v51 = vsel %vm611_vm0, %v517_v44, %v4505_v39  ;;  %v5360_v54 = vpack.c.bf16 %v634_v46, %v633_v45  ;;  %v4594_v33 = vld [vmem:[#allocation8 + $0x244] ss:$8 sps:$4 sm:$0xff]   ;;  %v4592_v34 = vld [vmem:[#allocation8 + $0x240] ss:$8 sps:$4 sm:$0xff]   ;;  %v4600_v35 = vld [vmem:[#allocation8 + $0x254] ss:$8 sps:$4 sm:$0xff]  }
  0xe4   : > { %3946 = vmatmul.mubr.msk.bf16.vlgmr.msra.gmra.mrb[0].mxu1 %vm811_vm2, %v5344_v38  ;;  %v4513_v53 = vpop.permute.xlu0 %4512  ;;  %v626_v55 = vsel %vm6149_vm1, %v616_v50, %v4509_v48  ;;  %v627_v56 = vsel %vm6149_vm1, %v617_v51, %v4510_v47  ;;  %v4598_v36 = vld [vmem:[#allocation8 + $0x250] ss:$8 sps:$4 sm:$0xff]   ;;  %v4612_v39 = vld [vmem:[#allocation8 + $0x274] ss:$8 sps:$4 sm:$0xff]   ;;  %v4618_v41 = vld [vmem:[#allocation8 + $0x284] ss:$8 sps:$4 sm:$0xff]  }
  0xe5   : > { %869 = vmatprep.mubr.bf16.mxu1 %v5080_v10  ;;  %909 = vmatpush1.bf16.msra.mxu1 %v4539_v37  ;;  %v4515_v58 = vunpack.i.h.bf16 %v4513_v53  ;;  %v4514_v59 = vunpack.i.l.bf16 %v4513_v53  ;;  %v4518_v60 = vpop.permute.xlu1 %4517  ;;  %v635_v0 = vmax.f32 %v626_v55, 0.0  ;;  %v636_v1 = vmax.f32 %v627_v56, 0.0  ;;  %v4606_v37 = vld [vmem:[#allocation8 + $0x264] ss:$8 sps:$4 sm:$0xff]   ;;  %v4610_v40 = vld [vmem:[#allocation8 + $0x270] ss:$8 sps:$4 sm:$0xff]  }
  0xe6   : > { %910 = vmatprep.subr.bf16.mxu1 %v4544_v42  ;;  %v4520_v2 = vunpack.i.h.bf16 %v4518_v60  ;;  %v4519_v3 = vunpack.i.l.bf16 %v4518_v60  ;;  %v4619_v42 = vld [vmem:[#allocation8 + $0xb0] ss:$8 sps:$4 sm:$0xff]   ;;  %v4616_v43 = vld [vmem:[#allocation8 + $0x280] ss:$8 sps:$4 sm:$0xff]   ;;  %v4620_v44 = vld [vmem:[#allocation8 + $0xc4] ss:$8 sps:$4 sm:$0xff]  }
  0xe7   : > { %v618_v5 = vsel %vm611_vm0, %v518_v62, %v4514_v59  ;;  %v619_v6 = vsel %vm611_vm0, %v519_v63, %v4515_v58  ;;  %v642_v8 = vpack.c.bf16 %v636_v1, %v635_v0  ;;  %2428 = vmatpush1.bf16.msra.mxu0 %v4619_v42  ;;  %v4624_v45 = vld [vmem:[#allocation8 + $0x294] ss:$8 sps:$4 sm:$0xff]   ;;  %v4625_v46 = vld [vmem:[#allocation8 + $0xc0] ss:$8 sps:$4 sm:$0xff]   ;;  %v4622_v47 = vld [vmem:[#allocation8 + $0x290] ss:$8 sps:$4 sm:$0xff]  }
  0xe8   : > { %v628_v9 = vsel %vm6149_vm1, %v618_v5, %v4519_v3  ;;  %v629_v11 = vsel %vm6149_vm1, %v619_v6, %v4520_v2  ;;  %v565_v14 = vpop.permute.xlu0 %564  ;;  %2429 = vmatprep.subr.bf16.mxu0 %v4620_v44  ;;  %v4630_v48 = vld [vmem:[#allocation8 + $0x2a4] ss:$8 sps:$4 sm:$0xff]   ;;  %v4628_v50 = vld [vmem:[#allocation8 + $0x2a0] ss:$8 sps:$4 sm:$0xff]   ;;  %v4638_v55 = vld [vmem:[#allocation8 + $0xf4] ss:$8 sps:$4 sm:$0xff]   ;;  %v671_v3 = vlaneseq  ;;  %v5415_v5 = vstv %s3956_s29 }
  0xe9   : > { %911 = vmatpush1.bf16.msra.mxu1 %v4542_v49  ;;  %v637_v16 = vmax.f32 %v628_v9, 0.0  ;;  %v638_v17 = vmax.f32 %v629_v11, 0.0  ;;  %v620_v19 = vsel %vm611_vm0, %v520_v15, %v565_v14  ;;  %v601_v20 = vpop.permute.xlu1 %600  ;;  %v4631_v49 = vld [vmem:[#allocation8 + $0xd0] ss:$8 sps:$4 sm:$0xff]   ;;  %v4632_v51 = vld [vmem:[#allocation8 + $0xe4] ss:$8 sps:$4 sm:$0xff]  }
  0xea   : > { %912 = vmatprep.subr.bf16.mxu1 %v4547_v52  ;;  %v630_v23 = vsel %vm6149_vm1, %v620_v19, %v601_v20  ;;  %v4636_v52 = vld [vmem:[#allocation8 + $0x2b4] ss:$8 sps:$4 sm:$0xff]   ;;  %v4637_v53 = vld [vmem:[#allocation8 + $0xe0] ss:$8 sps:$4 sm:$0xff]   ;;  %v4642_v56 = vld [vmem:[#allocation8 + $0x2c4] ss:$8 sps:$4 sm:$0xff]  }
  0xeb   : > { %v643_v22 = vpack.c.bf16 %v638_v17, %v637_v16  ;;  %v639_v24 = vmax.f32 %v630_v23, 0.0  ;;  %2430 = vmatpush1.bf16.msra.mxu0 %v4625_v46  ;;  %v4640_v58 = vld [vmem:[#allocation8 + $0x2c0] ss:$8 sps:$4 sm:$0xff]   ;;  %v4646_v59 = vld [vmem:[#allocation8 + $0x104] ss:$8 sps:$4 sm:$0xff]  }
  0xec   : > { %3947 = vmatmul.mubr.msk.bf16.gmra.mrb[4].mxu1 %vm811_vm2, %v5360_v54  ;;  %v4649_v60 = vld [vmem:[#allocation8 + $0x2d4] ss:$8 sps:$4 sm:$0xff]   ;;  %v4655_v62 = vld [vmem:[#allocation8 + $0x2e4] ss:$8 sps:$4 sm:$0xff]   ;;  %v4653_v63 = vld [vmem:[#allocation8 + $0x2e0] ss:$8 sps:$4 sm:$0xff]  }
  0xed   : > { %879 = vmatprep.mubr.bf16.mxu1 %v5080_v10  ;;  %913 = vmatpush1.bf16.msra.mxu1 %v4545_v57  ;;  %v644_v25 = vpack.c.bf16 %v639_v24, %v639_v24  ;;  %v4643_v57 = vld [vmem:[#allocation8 + $0xf0] ss:$8 sps:$4 sm:$0xff]   ;;  %v4661_v0 = vld [vmem:[#allocation8 + $0x2f4] ss:$8 sps:$4 sm:$0xff]   ;;  %v4667_v2 = vld [vmem:[#allocation8 + $0x304] ss:$8 sps:$4 sm:$0xff]  }
  0xee   : > { %914 = vmatprep.subr.bf16.mxu1 %v4550_v61  ;;  %v4647_v61 = vld [vmem:[#allocation8 + $0x2d0] ss:$8 sps:$4 sm:$0xff]   ;;  %v5421_v9 = vld [vmem:[#allocation6] sm:$0xf] }
  0xef   : > { %v4659_v1 = vld [vmem:[#allocation8 + $0x2f0] ss:$8 sps:$4 sm:$0xff]  }
  0xf1   : > { %915 = vmatpush1.bf16.msra.mxu1 %v4548_v4  ;;  %v5413_v4 = vshrl.u32 %v671_v3, 7 }
  0xf2   : > { %916 = vmatprep.subr.bf16.mxu1 %v4553_v7 }
  0xf3   : > { %v992_v6 = vadd.s32 8, %v5413_v4  ;;  %v673_v7 = vsub.s32 0, %v5413_v4  ;;  %v6150_v11 = vsub.s32 1, %v5413_v4  ;;  %v993_v14 = vadd.s32 16, %v5413_v4 }
  0xf4   : > { %3948 = vmatmul.mubr.msk.bf16.gmra.mrb[8].mxu1 %vm811_vm2, %v642_v8  ;;  %v994_v16 = vadd.s32 24, %v5413_v4 }
  0xf5   : > { %889 = vmatprep.mubr.bf16.mxu1 %v5080_v10  ;;  %917 = vmatpush1.bf16.msra.mxu1 %v4551_v12  ;;  %v1002_v12 = vadd.s32 %v5415_v5, %v992_v6  ;;  %v5434_v15 = vrot.slane %v5421_v9, %v6150_v11  ;;  %v4753_v11 = vld [vmem:[#allocation8 + $0x3e4] ss:$8 sps:$4 sm:$0xff]  }
  0xf6   : > { %918 = vmatprep.subr.bf16.mxu1 %v4556_v13  ;;  %v5428_v13 = vrot.slane %v5421_v9, %v673_v7 }
  0xf7   : > { %vm1011_vm5 = vcmp.ge.s32.totalorder %v1002_v12, 0  ;;  %vm1020_vm6 = vcmp.lt.s32.totalorder %v1002_v12, 128 }
  0xf8   : > { %vm5444_vm8 = vmand %vm1011_vm5, %vm1020_vm6  ;;  %vm2628_vm5 = vcmask 1046528  }
  0xf9   : > { %919 = vmatpush1.bf16.msra.mxu1 %v4554_v18 }
  0xfa   : > { %1923 = vmatprep.subr.bf16.mxu1 %v4570_v21  ;;  %v1003_v21 = vadd.s32 %v5415_v5, %v993_v14 }
  0xfc   : > { %3949 = vmatmul.mubr.msk.bf16.gmra.mrb[12].mxu1 %vm811_vm2, %v643_v22  ;;  %vm1012_vm9 = vcmp.ge.s32.totalorder %v1003_v21, 0  ;;  %vm1021_vm10 = vcmp.lt.s32.totalorder %v1003_v21, 128 }
  0xfd   : > { %899 = vmatprep.mubr.bf16.mxu1 %v5080_v10  ;;  %vm5465_vm13 = vmand %vm1012_vm9, %vm1021_vm10 }
 0x104   : > { %3950 = vmatmul.mubr.msk.bf16.gmra.mrb[16].mxu1 %vm811_vm2, %v644_v25 }
 0x105   : > { %940 = vmatprep.mubr.bf16.mxu1 %v5080_v10 }
 0x10c   : > { %3951 = vmatmul.mubr.msk.bf16.vlgmr.msra.gmra.mrb[20].mxu1 %vm811_vm2, %v5344_v38  ;;  %v4604_v38 = vld [vmem:[#allocation8 + $0x260] ss:$8 sps:$4 sm:$0xff]  }
 0x10d   : > { %950 = vmatprep.mubr.bf16.mxu1 %v5080_v10  ;;  %1924 = vmatpush1.bf16.msra.mxu1 %v4568_v26 }
 0x10e   : > { %1925 = vmatprep.subr.bf16.mxu1 %v4576_v27 }
 0x111   : > { %1926 = vmatpush1.bf16.msra.mxu1 %v4574_v28 }
 0x112   : > { %1927 = vmatprep.subr.bf16.mxu1 %v4582_v29  ;;  %v1004_v29 = vadd.s32 %v5415_v5, %v994_v16 }
 0x114   : > { %3952 = vmatmul.mubr.msk.bf16.gmra.mrb[24].mxu1 %vm811_vm2, %v5360_v54  ;;  %v4634_v54 = vld [vmem:[#allocation8 + $0x2b0] ss:$8 sps:$4 sm:$0xff]   ;;  %vm1013_vm11 = vcmp.ge.s32.totalorder %v1004_v29, 0  ;;  %vm1022_vm12 = vcmp.lt.s32.totalorder %v1004_v29, 128 }
 0x115   : > { %960 = vmatprep.mubr.bf16.mxu1 %v5080_v10  ;;  %1928 = vmatpush1.bf16.msra.mxu1 %v4580_v30  ;;  %vm5477_vm14 = vmand %vm1013_vm11, %vm1022_vm12 }
 0x116   : > { %1929 = vmatprep.subr.bf16.mxu1 %v4588_v31 }
 0x119   : > { %1930 = vmatpush1.bf16.msra.mxu1 %v4586_v32  ;;  %v996_v32 = vadd.s32 40, %v5413_v4 }
 0x11a   : > { %1931 = vmatprep.subr.bf16.mxu1 %v4594_v33 }
 0x11c   : > { %3953 = vmatmul.mubr.msk.bf16.gmra.mrb[28].mxu1 %vm811_vm2, %v642_v8  ;;  %v1001_v8 = vadd.s32 %v5415_v5, %v5413_v4 }
 0x11d   : > { %970 = vmatprep.mubr.bf16.mxu1 %v5080_v10  ;;  %1932 = vmatpush1.bf16.msra.mxu1 %v4592_v34 }
 0x11e   : > { %1933 = vmatprep.subr.bf16.mxu1 %v4600_v35  ;;  %vm1010_vm3 = vcmp.ge.s32.totalorder %v1001_v8, 0  ;;  %vm1019_vm4 = vcmp.lt.s32.totalorder %v1001_v8, 128 }
 0x11f   : > { %vm5437_vm7 = vmand %vm1010_vm3, %vm1019_vm4  ;;  %vm1442_vm3 = vsmask.f32 7424 }
 0x121   : > { %1934 = vmatpush1.bf16.msra.mxu1 %v4598_v36 }
 0x122   : > { %1935 = vmatprep.subr.bf16.mxu1 %v4606_v37 }
 0x124   : > { %3954 = vmatmul.mubr.msk.bf16.gmra.mrb[32].mxu1 %vm811_vm2, %v643_v22 }
 0x125   : > { %980 = vmatprep.mubr.bf16.mxu1 %v5080_v10  ;;  %1936 = vmatpush1.bf16.msra.mxu1 %v4604_v38  ;;  %v4626_v10 = vld [vmem:[#allocation8 + $0xd4] ss:$8 sps:$4 sm:$0xff]   ;;  %v997_v38 = vadd.s32 48, %v5413_v4 }
 0x126   : > { %1937 = vmatprep.subr.bf16.mxu1 %v4612_v39  ;;  %2431 = vmatprep.subr.bf16.mxu0 %v4626_v10 }
 0x127   : > { %2432 = vmatpush1.bf16.msra.mxu0 %v4631_v49 }
 0x128   : > { %2433 = vmatprep.subr.bf16.mxu0 %v4632_v51 }
 0x129   : > { %1938 = vmatpush1.bf16.msra.mxu1 %v4610_v40 }
 0x12a   : > { %1939 = vmatprep.subr.bf16.mxu1 %v4618_v41  ;;  %v1006_v41 = vadd.s32 %v5415_v5, %v996_v32 }
 0x12b   : > { %2434 = vmatpush1.bf16.msra.mxu0 %v4637_v53 }
 0x12c   : > { %3955 = vmatmul.mubr.msk.bf16.gmra.mrb[36].mxu1 %vm811_vm2, %v644_v25  ;;  %2435 = vmatprep.subr.bf16.mxu0 %v4638_v55  ;;  %v995_v25 = vadd.s32 32, %v5413_v4  ;;  %vm5491_vm2 = vmpackc.low %vm5444_vm8, %vm5437_vm7  ;;  %vm1015_vm4 = vcmp.ge.s32.totalorder %v1006_v41, 0  ;;  %vm1024_vm6 = vcmp.lt.s32.totalorder %v1006_v41, 128  ;;  %v4751_v55 = vld [vmem:[#allocation8 + $0x3e0] ss:$8 sps:$4 sm:$0xff]  }
 0x12d   : > { %1940 = vmatpush1.bf16.msra.mxu1 %v4616_v43 }
 0x12e   : > { %1941 = vmatprep.subr.bf16.mxu1 %v4624_v45  ;;  %v1005_v36 = vadd.s32 %v5415_v5, %v995_v25  ;;  %v4644_v45 = vld [vmem:[#allocation8 + $0x100] ss:$8 sps:$4 sm:$0xff]  }
 0x12f   : > { %2436 = vmatpush1.bf16.msra.mxu0 %v4643_v57  ;;  %v5498_v57 = vadd.s32 %v5415_v5, %v997_v38  ;;  %v4656_v25 = vld [vmem:[#allocation8 + $0x120] ss:$8 sps:$4 sm:$0xff]  }
 0x130   : > { %2478 = vmatprep.subr.bf16.mxu0 %v4646_v59  ;;  %vm1014_vm15 = vcmp.ge.s32.totalorder %v1005_v36, 0  ;;  %vm1023_vm0 = vcmp.lt.s32.totalorder %v1005_v36, 128 }
 0x131   : > { %1942 = vmatpush1.bf16.msra.mxu1 %v4622_v47  ;;  %v998_v47 = vadd.s32 56, %v5413_v4  ;;  %vm1016_vm9 = vcmp.ge.s32.totalorder %v5498_v57, 0  ;;  %vm1025_vm10 = vcmp.lt.s32.totalorder %v5498_v57, 128  ;;  %vm5519_vm11 = vmand %vm1014_vm15, %vm1023_vm0 }
 0x132   : > { %1943 = vmatprep.subr.bf16.mxu1 %v4630_v48  ;;  %vm5538_vm15 = vmand %vm1015_vm4, %vm1024_vm6 }
 0x133   : > { %vm5554_vm0 = vmpackc.low %vm5477_vm14, %vm5465_vm13 }
 0x134   : > { %vm5585_vm6 = vmand %vm1016_vm9, %vm1025_vm10 }
 0x135   : > { %1944 = vmatpush1.bf16.msra.mxu1 %v4628_v50  ;;  %v4652_v50 = vld [vmem:[#allocation8 + $0x114] ss:$8 sps:$4 sm:$0xff]   ;;  %vm5629_vm10 = vmpackc.low %vm5538_vm15, %vm5519_vm11 }
 0x136   : > { %1945 = vmatprep.subr.bf16.mxu1 %v4636_v52 }
 0x139   : > { %1946 = vmatpush1.bf16.msra.mxu1 %v4634_v54 }
 0x13a   : > { %1947 = vmatprep.subr.bf16.mxu1 %v4642_v56 }
 0x13d   : > { %1948 = vmatpush1.bf16.msra.mxu1 %v4640_v58 }
 0x13e   : > { %1949 = vmatprep.subr.bf16.mxu1 %v4649_v60 }
 0x141   : > { %1950 = vmatpush1.bf16.msra.mxu1 %v4647_v61 }
 0x142   : > { %1951 = vmatprep.subr.bf16.mxu1 %v4655_v62 }
 0x145   : > { %1952 = vmatpush1.bf16.msra.mxu1 %v4653_v63  ;;  %v4650_v63 = vld [vmem:[#allocation8 + $0x110] ss:$8 sps:$4 sm:$0xff]  }
 0x146   : > { %1953 = vmatprep.subr.bf16.mxu1 %v4661_v0  ;;  %v4658_v0 = vld [vmem:[#allocation8 + $0x124] ss:$8 sps:$4 sm:$0xff]  }
 0x149   : > { %1954 = vmatpush1.bf16.msra.mxu1 %v4659_v1  ;;  %v5510_v1 = vadd.s32 %v5415_v5, %v998_v47 }
 0x14a   : > { %1996 = vmatprep.subr.bf16.mxu1 %v4667_v2 }
 0x14b   : > { %vm1017_vm12 = vcmp.ge.s32.totalorder %v5510_v1, 0  ;;  %vm1026_vm4 = vcmp.lt.s32.totalorder %v5510_v1, 128 }
 0x14c   : > { %vm5614_vm9 = vmand %vm1017_vm12, %vm1026_vm4 }
 0x1b7   : > { %v861_v17 = vpop.f32.mrb[0].mxu1 }
 0x1b8   : > { %v862_v19 = vadd.f32 %v861_v17, %v5428_v13  ;;  %v863_v20 = vpop.f32.mrb[1].mxu1  ;;  %v4732_v17 = vld [vmem:[#allocation8 + $0x1e4] ss:$8 sps:$4 sm:$0xff]  }
 0x1b9   : > { %v864_v22 = vadd.f32 %v863_v20, %v5434_v15  ;;  %v865_v23 = vpop.f32.mrb[2].mxu1  ;;  %v999_v20 = vadd.s32 64, %v5413_v4 }
 0x1ba   : > { %v1055_v26 = vsel %vm5437_vm7, %v862_v19, 0.0  ;;  %v866_v27 = vadd.f32 %v865_v23, %v5428_v13  ;;  %v867_v28 = vpop.f32.mrb[3].mxu1 }
 0x1bb   : > { %v1056_v30 = vsel %vm5437_vm7, %v864_v22, 0.0  ;;  %v868_v31 = vadd.f32 %v867_v28, %v5434_v15 }
 0x1bc   : > { %v4239_v33 = vpack.c.bf16 %v1056_v30, %v1055_v26  ;;  %v1059_v34 = vsel %vm5444_vm8, %v866_v27, 0.0  ;;  %v4915_v61 = vpack.c.bf16 %v866_v27, %v862_v19 }
 0x1bd   : > { %v1060_v35 = vsel %vm5444_vm8, %v868_v31, 0.0  ;;  %v4910_v46 = vpack.c.bf16 %v1059_v34, %v1055_v26  ;;  %v4912_v56 = vpack.c.bf16 %v868_v31, %v864_v22  ;;  %v4664_v31 = vld [vmem:[#allocation8 + $0x134] ss:$8 sps:$4 sm:$0xff]  }
 0x1be   : > { %1203 = vst [vmem:[#allocation3] sm:$0xff] %v4239_v33  ;;  %v5462_v37 = vpack.c.bf16 %v1060_v35, %v1059_v34  ;;  %v4909_v44 = vpack.c.bf16 %v1060_v35, %v1056_v30 }
 0x1bf   : > { %v871_v39 = vpop.f32.mrb[4].mxu1  ;;  %4913 = vmatprep.mubr.msk.bf16.mxu0 %vm5491_vm2, %v4912_v56  ;;  %v1446_v60 = vshll.u32 %v4910_v46, 16  ;;  %v1444_v14 = vshrl.u32 %v4910_v46, 16  ;;  %v4662_v46 = vld [vmem:[#allocation8 + $0x130] ss:$8 sps:$4 sm:$0xff]  }
 0x1c0   : > { %v5471_v42 = vadd.f32 %v871_v39, %v5428_v13  ;;  %v873_v43 = vpop.f32.mrb[5].mxu1  ;;  %v1458_v54 = vshll.u32 %v4909_v44, 16  ;;  %4916 = vmatmul.mubr.msk.bf16.vlgmr.msra.gmra.mrb[0].mxu0 %vm5491_vm2, %v4915_v61  ;;  %v1456_v19 = vshrl.u32 %v4909_v44, 16 }
 0x1c1   : > { %v5475_v10 = vadd.f32 %v873_v43, %v5434_v15  ;;  %v875_v48 = vpop.f32.mrb[6].mxu1  ;;  %2479 = vmatpush1.bf16.msra.mxu0 %v4644_v45  ;;  %v1448_v3 = vrot.slane %v1446_v60, 1 }
 0x1c2   : > { %v1063_v51 = vsel %vm5465_vm13, %v5471_v42, 0.0  ;;  %v5485_v52 = vadd.f32 %v875_v48, %v5428_v13  ;;  %v877_v53 = vpop.f32.mrb[7].mxu1  ;;  %2480 = vmatprep.subr.bf16.mxu0 %v4652_v50  ;;  %v1460_v6 = vrot.slane %v1458_v54, 1 }
 0x1c3   : > { %v1064_v58 = vsel %vm5465_vm13, %v5475_v10, 0.0  ;;  %v878_v59 = vadd.f32 %v877_v53, %v5434_v15  ;;  %v1449_v33 = vor.u32 %v1448_v3, %v1444_v14  ;;  %v4665_v53 = vld [vmem:[#allocation8 + $0x300] ss:$8 sps:$4 sm:$0xff]  }
 0x1c4   : > { %v1067_v62 = vsel %vm5477_vm14, %v5485_v52, 0.0  ;;  %v1461_v32 = vor.u32 %v1460_v6, %v1456_v19  ;;  %v4923_v47 = vpack.c.bf16 %v5485_v52, %v5471_v42 }
 0x1c5   : > { %v1068_v2 = vsel %vm5477_vm14, %v878_v59, 0.0  ;;  %v2551_v8 = vld [vmem:[#allocation3] sm:$0xee]  ;;  %2481 = vmatpush1.bf16.msra.mxu0 %v4650_v63  ;;  %v5528_v26 = vpack.c.bf16 %v1067_v62, %v1063_v51  ;;  %v4920_v43 = vpack.c.bf16 %v878_v59, %v5475_v10  ;;  %v4673_v62 = vld [vmem:[#allocation8 + $0x314] ss:$8 sps:$4 sm:$0xff]  }
 0x1c6   : > { %v4123_v12 = vcombine.low %v2551_v8, %v5462_v37  ;;  %v4124_v21 = vcombine.high %v2551_v8, %v5462_v37  ;;  %v5530_v27 = vpack.c.bf16 %v1068_v2, %v1064_v58  ;;  %2482 = vmatprep.subr.bf16.mxu0 %v4658_v0  ;;  %v4670_v58 = vld [vmem:[#allocation8 + $0x144] ss:$8 sps:$4 sm:$0xff]   ;;  %v1009_v2 = vadd.s32 %v5415_v5, %v999_v20 }
 0x1c7   : > { %v881_v16 = vpop.f32.mrb[8].mxu1  ;;  %v1451_v39 = vshll.u32 %v5528_v26, 16  ;;  %4921 = vmatprep.mubr.msk.bf16.mxu0 %vm5554_vm0, %v4920_v43  ;;  %v1491_v42 = vshrl.u32 %v5528_v26, 16  ;;  %v2630_v59 = vrot.slane %v5528_v26, 1  ;;  %v685_v26 = vsub.s32 3, %v5413_v4 }
 0x1c8   : > { %v5526_v22 = vadd.f32 %v881_v16, %v5428_v13  ;;  %v883_v23 = vpop.f32.mrb[9].mxu1  ;;  %v2629_v34 = vrot.slane %v4123_v12, 1  ;;  %v1463_v38 = vshll.u32 %v5530_v27, 16  ;;  %4924 = vmatmul.mubr.msk.bf16.gmra.mrb[4].mxu0 %vm5554_vm0, %v4923_v47  ;;  %v1499_v48 = vshrl.u32 %v5530_v27, 16  ;;  %v4668_v12 = vld [vmem:[#allocation8 + $0x140] ss:$8 sps:$4 sm:$0xff]  }
 0x1c9   : > { %v5534_v28 = vadd.f32 %v883_v23, %v5434_v15  ;;  %v885_v29 = vpop.f32.mrb[10].mxu1  ;;  %v2632_v50 = vrot.slane %v4124_v21, 1  ;;  %2483 = vmatpush1.bf16.msra.mxu0 %v4656_v25  ;;  %v1453_v54 = vrot.slane %v1451_v39, 1  ;;  %v2633_v52 = vrot.slane %v5530_v27, 1  ;;  %v4671_v21 = vld [vmem:[#allocation8 + $0x310] ss:$8 sps:$4 sm:$0xff]  }
 0x1ca   : > { %v1071_v35 = vsel %vm5519_vm11, %v5526_v22, 0.0  ;;  %v5546_v36 = vadd.f32 %v885_v29, %v5428_v13  ;;  %v887_v37 = vpop.f32.mrb[11].mxu1  ;;  %v1465_v51 = vrot.slane %v1463_v38, 1  ;;  %2484 = vmatprep.subr.bf16.mxu0 %v4664_v31  ;;  %v5598_v6 = vsel %vm2628_vm5, %v2629_v34, %v2630_v59  ;;  %v4676_v23 = vld [vmem:[#allocation8 + $0x154] ss:$8 sps:$4 sm:$0xff]  }
 0x1cb   : > { %v1072_v44 = vsel %vm5519_vm11, %v5534_v28, 0.0  ;;  %v888_v45 = vadd.f32 %v887_v37, %v5434_v15  ;;  %v1454_v61 = vsel %vm1442_vm3, %v1449_v33, %v1453_v54  ;;  %v5593_v3 = vsel %vm2628_vm5, %v2632_v50, %v2633_v52  ;;  %v4679_v34 = vld [vmem:[#allocation8 + $0x324] ss:$8 sps:$4 sm:$0xff]  }
 0x1cc   : > { %v1075_v10 = vsel %vm5538_vm15, %v5546_v36, 0.0  ;;  %v1466_v60 = vsel %vm1442_vm3, %v1461_v32, %v1465_v51  ;;  %v1501_v25 = vor.u32 %v1499_v48, %v1465_v51  ;;  %v1493_v29 = vor.u32 %v1491_v42, %v1453_v54  ;;  %v4744_v0 = vld [vmem:[#allocation8 + $0x404] ss:$8 sps:$4 sm:$0xff]  }
 0x1cd   : > { %v1076_v56 = vsel %vm5538_vm15, %v888_v45, 0.0  ;;  %1955 = vmatprep.mubr.bf16.mxu1 %v1466_v60  ;;  %2485 = vmatpush1.bf16.msra.mxu0 %v4662_v46  ;;  %v5605_v5 = vpack.c.bf16 %v1075_v10, %v1071_v35  ;;  %v4928_v37 = vpack.c.bf16 %v888_v45, %v5534_v28  ;;  %vm1018_vm12 = vcmp.ge.s32.totalorder %v1009_v2, 0  ;;  %v4677_v45 = vld [vmem:[#allocation8 + $0x320] ss:$8 sps:$4 sm:$0xff]   ;;  %v4682_v10 = vld [vmem:[#allocation8 + $0x164] ss:$8 sps:$4 sm:$0xff]  }
 0x1ce   : > { %1956 = vmatmul.mubr.bf16.vlgmr.msra.gmra.mrb[40].mxu1 %v1454_v61  ;;  %v5603_v14 = vpack.c.bf16 %v1076_v56, %v1072_v44  ;;  %2486 = vmatprep.subr.bf16.mxu0 %v4670_v58  ;;  %vm1027_vm4 = vcmp.lt.s32.totalorder %v1009_v2, 128  ;;  %v4674_v44 = vld [vmem:[#allocation8 + $0x150] ss:$8 sps:$4 sm:$0xff]   ;;  %v4931_v46 = vpack.c.bf16 %v5546_v36, %v5526_v22  ;;  %v681_v2 = vsub.s32 2, %v5413_v4 }
 0x1cf   : > { %v891_v63 = vpop.f32.mrb[12].mxu1  ;;  %1997 = vmatpush1.bf16.msra.mxu1 %v4665_v53  ;;  %4929 = vmatprep.mubr.msk.bf16.mxu0 %vm5629_vm10, %v4928_v37  ;;  %v1495_v38 = vshll.u32 %v5605_v5, 16  ;;  %v2641_v36 = vrot.slane %v5605_v5, 1  ;;  %v4685_v53 = vld [vmem:[#allocation8 + $0x334] ss:$8 sps:$4 sm:$0xff]   ;;  %v1523_v58 = vshrl.u32 %v5605_v5, 16  ;;  %vm5658_vm1 = vmand %vm1018_vm12, %vm1027_vm4 }
 0x1d0   : > { %v5601_v8 = vadd.f32 %v891_v63, %v5428_v13  ;;  %v893_v57 = vpop.f32.mrb[13].mxu1  ;;  %1998 = vmatprep.subr.bf16.mxu1 %v4673_v62  ;;  %v1503_v1 = vshll.u32 %v5603_v14, 16  ;;  %4932 = vmatmul.mubr.msk.bf16.gmra.mrb[8].mxu0 %vm5629_vm10, %v4931_v46  ;;  %v1531_v51 = vshrl.u32 %v5603_v14, 16  ;;  %v2643_v22 = vrot.slane %v5603_v14, 1  ;;  %vm5686_vm12 = vmpackc.low %vm5614_vm9, %vm5585_vm6  ;;  %v4748_v60 = vld [vmem:[#allocation8 + $0x410] ss:$8 sps:$4 sm:$0xff]  }
 0x1d1   : > { %v5608_v16 = vadd.f32 %v893_v57, %v5434_v15  ;;  %v895_v19 = vpop.f32.mrb[14].mxu1  ;;  %2487 = vmatpush1.bf16.msra.mxu0 %v4668_v12  ;;  %v1497_v48 = vrot.slane %v1495_v38, 1  ;;  %v5670_v62 = vsel %vm2628_vm5, %v2630_v59, %v2641_v36  ;;  %v4680_v12 = vld [vmem:[#allocation8 + $0x160] ss:$8 sps:$4 sm:$0xff]   ;;  %v4683_v59 = vld [vmem:[#allocation8 + $0x330] ss:$8 sps:$4 sm:$0xff]  }
 0x1d2   : > { %v1079_v31 = vsel %vm5585_vm6, %v5601_v8, 0.0  ;;  %v5622_v32 = vadd.f32 %v895_v19, %v5428_v13  ;;  %v897_v33 = vpop.f32.mrb[15].mxu1  ;;  %v1505_v47 = vrot.slane %v1503_v1, 1  ;;  %2488 = vmatprep.subr.bf16.mxu0 %v4676_v23  ;;  %v5665_v61 = vsel %vm2628_vm5, %v2633_v52, %v2643_v22  ;;  %v4688_v19 = vld [vmem:[#allocation8 + $0x174] ss:$8 sps:$4 sm:$0xff]  }
 0x1d3   : > { %v1080_v39 = vsel %vm5585_vm6, %v5608_v16, 0.0  ;;  %v898_v43 = vadd.f32 %v897_v33, %v5434_v15  ;;  %1999 = vmatpush1.bf16.msra.mxu1 %v4671_v21  ;;  %v1498_v56 = vsel %vm1442_vm3, %v1493_v29, %v1497_v48  ;;  %v1525_v33 = vor.u32 %v1523_v58, %v1497_v48  ;;  %v4695_v58 = vld [vmem:[#allocation8 + $0x350] ss:$8 sps:$4 sm:$0xff]  }
 0x1d4   : > { %v1083_v28 = vsel %vm5614_vm9, %v5622_v32, 0.0  ;;  %2000 = vmatprep.subr.bf16.mxu1 %v4679_v34  ;;  %v1506_v54 = vsel %vm1442_vm3, %v1501_v25, %v1505_v47  ;;  %v4691_v25 = vld [vmem:[#allocation8 + $0x344] ss:$8 sps:$4 sm:$0xff]   ;;  %v4939_v37 = vpack.c.bf16 %v5622_v32, %v5601_v8  ;;  %v4689_v8 = vld [vmem:[#allocation8 + $0x340] ss:$8 sps:$4 sm:$0xff]  }
 0x1d5   : > { %v1084_v50 = vsel %vm5614_vm9, %v898_v43, 0.0  ;;  %1965 = vmatprep.mubr.bf16.mxu1 %v1506_v54  ;;  %2489 = vmatpush1.bf16.msra.mxu0 %v4674_v44  ;;  %v5676_v5 = vpack.c.bf16 %v1083_v28, %v1079_v31  ;;  %v4936_v29 = vpack.c.bf16 %v898_v43, %v5608_v16  ;;  %v5704_v43 = vrot.slane %v5421_v9, %v681_v2  ;;  %v4686_v44 = vld [vmem:[#allocation8 + $0x170] ss:$8 sps:$4 sm:$0xff]   ;;  %v4694_v32 = vld [vmem:[#allocation8 + $0x184] ss:$8 sps:$4 sm:$0xff]  }
 0x1d6   : > { %1966 = vmatmul.mubr.bf16.gmra.mrb[44].mxu1 %v1498_v56  ;;  %v5674_v14 = vpack.c.bf16 %v1084_v50, %v1080_v39  ;;  %2490 = vmatprep.subr.bf16.mxu0 %v4682_v10  ;;  %v4697_v50 = vld [vmem:[#allocation8 + $0x354] ss:$8 sps:$4 sm:$0xff]   ;;  %v4692_v54 = vld [vmem:[#allocation8 + $0x180] ss:$8 sps:$4 sm:$0xff]  }
 0x1d7   : > { %v901_v42 = vpop.f32.mrb[16].mxu1  ;;  %2001 = vmatpush1.bf16.msra.mxu1 %v4677_v45  ;;  %4937 = vmatprep.mubr.msk.bf16.mxu0 %vm5686_vm12, %v4936_v29  ;;  %v1527_v34 = vshll.u32 %v5676_v5, 16  ;;  %v2649_v16 = vrot.slane %v5676_v5, 1  ;;  %v5709_v45 = vrot.slane %v5421_v9, %v685_v26  ;;  %v1555_v29 = vshrl.u32 %v5676_v5, 16  ;;  %v4720_v5 = vld [vmem:[#allocation8 + $0x390] ss:$8 sps:$4 sm:$0xff]  }
 0x1d8   : > { %v902_v63 = vadd.f32 %v901_v42, %v5428_v13  ;;  %v903_v57 = vpop.f32.mrb[17].mxu1  ;;  %v1533_v13 = vor.u32 %v1531_v51, %v1505_v47  ;;  %2002 = vmatprep.subr.bf16.mxu1 %v4685_v53  ;;  %v1535_v31 = vshll.u32 %v5674_v14, 16  ;;  %4940 = vmatmul.mubr.msk.bf16.gmra.mrb[12].mxu0 %vm5686_vm12, %v4939_v37  ;;  %v2651_v38 = vrot.slane %v5674_v14, 1  ;;  %v4700_v42 = vld [vmem:[#allocation8 + $0x194] ss:$8 sps:$4 sm:$0xff]  }
 0x1d9   : > { %v904_v27 = vadd.f32 %v903_v57, %v5434_v15  ;;  %v905_v52 = vpop.f32.mrb[18].mxu1  ;;  %2491 = vmatpush1.bf16.msra.mxu0 %v4680_v12  ;;  %v5706_v28 = vrot.slane %v1527_v34, 1  ;;  %v5719_v48 = vsel %vm2628_vm5, %v2641_v36, %v2649_v16  ;;  %v4703_v12 = vld [vmem:[#allocation8 + $0x364] ss:$8 sps:$4 sm:$0xff]   ;;  %v1563_v26 = vshrl.u32 %v5674_v14, 16 }
 0x1da   : > { %v1087_v21 = vsel %vm5658_vm1, %v902_v63, 0.0  ;;  %v906_v23 = vpop.f32.mrb[19].mxu1  ;;  %v1537_v46 = vrot.slane %v1535_v31, 1  ;;  %2492 = vmatprep.subr.bf16.mxu0 %v4688_v19  ;;  %v5714_v47 = vsel %vm2628_vm5, %v2643_v22, %v2651_v38  ;;  %v4781_v15 = vld [vmem:[#allocation8 + $0x494] ss:$8 sps:$4 sm:$0xff]  }
 0x1db   : > { %v1088_v1 = vsel %vm5658_vm1, %v904_v27, 0.0  ;;  %2003 = vmatpush1.bf16.msra.mxu1 %v4683_v59  ;;  %v1530_v10 = vsel %vm1442_vm3, %v1525_v33, %v5706_v28  ;;  %v4709_v33 = vld [vmem:[#allocation8 + $0x374] ss:$8 sps:$4 sm:$0xff]  }
 0x1dc   : > { %v4255_v39 = vpack.c.bf16 %v1088_v1, %v1087_v21  ;;  %2004 = vmatprep.subr.bf16.mxu1 %v4691_v25  ;;  %v1538_v9 = vsel %vm1442_vm3, %v1533_v13, %v1537_v46  ;;  %v4698_v13 = vld [vmem:[#allocation8 + $0x190] ss:$8 sps:$4 sm:$0xff]   ;;  %v4701_v21 = vld [vmem:[#allocation8 + $0x360] ss:$8 sps:$4 sm:$0xff]   ;;  %v4706_v25 = vld [vmem:[#allocation8 + $0x1a4] ss:$8 sps:$4 sm:$0xff]  }
 0x1dd   : > { %1975 = vmatprep.mubr.bf16.mxu1 %v1538_v9  ;;  %2493 = vmatpush1.bf16.msra.mxu0 %v4686_v44  ;;  %v4707_v9 = vld [vmem:[#allocation8 + $0x370] ss:$8 sps:$4 sm:$0xff]  }
 0x1de   : > { %1219 = vst [vmem:[#allocation3 + $0x80] sm:$0x11] %v4255_v39  ;;  %1976 = vmatmul.mubr.bf16.gmra.mrb[48].mxu1 %v1530_v10  ;;  %2494 = vmatprep.subr.bf16.mxu0 %v4694_v32  ;;  %v1565_v39 = vor.u32 %v1563_v26, %v1537_v46  ;;  %v1557_v46 = vor.u32 %v1555_v29, %v5706_v28  ;;  %v4715_v26 = vld [vmem:[#allocation8 + $0x384] ss:$8 sps:$4 sm:$0xff]  }
 0x1df   : > { %v942_v51 = vpop.f32.mrb[20].mxu1  ;;  %2005 = vmatpush1.bf16.msra.mxu1 %v4689_v8  ;;  %v4704_v8 = vld [vmem:[#allocation8 + $0x1a0] ss:$8 sps:$4 sm:$0xff]   ;;  %v4718_v29 = vld [vmem:[#allocation8 + $0x1c4] ss:$8 sps:$4 sm:$0xff]  }
 0x1e0   : > { %v5725_v53 = vadd.f32 %v942_v51, %v5704_v43  ;;  %v944_v22 = vpop.f32.mrb[21].mxu1  ;;  %2006 = vmatprep.subr.bf16.mxu1 %v4697_v50 }
 0x1e1   : > { %v945_v36 = vadd.f32 %v944_v22, %v5709_v45  ;;  %v946_v56 = vpop.f32.mrb[22].mxu1  ;;  %2495 = vmatpush1.bf16.msra.mxu0 %v4692_v54  ;;  %v4712_v54 = vld [vmem:[#allocation8 + $0x1b4] ss:$8 sps:$4 sm:$0xff]  }
 0x1e2   : > { %v1057_v63 = vsel %vm5437_vm7, %v5725_v53, 0.0  ;;  %v5732_v57 = vadd.f32 %v946_v56, %v5704_v43  ;;  %v948_v2 = vpop.f32.mrb[23].mxu1  ;;  %2496 = vmatprep.subr.bf16.mxu0 %v4700_v42 }
 0x1e3   : > { %v1058_v27 = vsel %vm5437_vm7, %v945_v36, 0.0  ;;  %v949_v52 = vadd.f32 %v948_v2, %v5709_v45  ;;  %2007 = vmatpush1.bf16.msra.mxu1 %v4695_v58 }
 0x1e4   : > { %v4240_v59 = vpack.c.bf16 %v1058_v27, %v1057_v63  ;;  %v1061_v19 = vsel %vm5444_vm8, %v5732_v57, 0.0  ;;  %2008 = vmatprep.subr.bf16.mxu1 %v4703_v12 }
 0x1e5   : > { %v1062_v23 = vsel %vm5444_vm8, %v949_v52, 0.0  ;;  %v1301_v18 = vld [vmem:[#allocation3 + $0x80] sm:$0x11]  ;;  %2497 = vmatpush1.bf16.msra.mxu0 %v4698_v13  ;;  %v4941_v32 = vpack.c.bf16 %v1061_v19, %v1057_v63 }
 0x1e6   : > { %1204 = vst [vmem:[#allocation3 + $0x8] sm:$0xff] %v4240_v59  ;;  %v5744_v31 = vpack.c.bf16 %v1062_v23, %v1061_v19  ;;  %v3992_v34 = vcombine.high %v1301_v18, %v1301_v18  ;;  %v3991_v1 = vcombine.low %v1301_v18, %v1301_v18  ;;  %v5749_v50 = vpack.c.bf16 %v1062_v23, %v1058_v27  ;;  %v4713_v23 = vld [vmem:[#allocation8 + $0x380] ss:$8 sps:$4 sm:$0xff]  }
 0x1e7   : > { %v952_v37 = vpop.f32.mrb[24].mxu1  ;;  %2009 = vmatpush1.bf16.msra.mxu1 %v4701_v21  ;;  %2498 = vmatprep.subr.bf16.mxu0 %v4706_v25  ;;  %v1470_v12 = vshll.u32 %v4941_v32, 16  ;;  %v4944_v27 = vpack.c.bf16 %v949_v52, %v945_v36  ;;  %v4710_v52 = vld [vmem:[#allocation8 + $0x1b0] ss:$8 sps:$4 sm:$0xff]  }
 0x1e8   : > { %v5747_v44 = vadd.f32 %v952_v37, %v5704_v43  ;;  %v954_v24 = vpop.f32.mrb[25].mxu1  ;;  %v1567_v10 = vshll.u32 %v3992_v34, 16  ;;  %v1559_v56 = vshll.u32 %v3991_v1, 16  ;;  %v2659_v58 = vrot.slane %v3992_v34, 1  ;;  %2010 = vmatprep.subr.bf16.mxu1 %v4709_v33  ;;  %v4722_v37 = vld [vmem:[#allocation8 + $0x394] ss:$8 sps:$4 sm:$0xff]  }
 0x1e9   : > { %v5752_v51 = vadd.f32 %v954_v24, %v5709_v45  ;;  %v956_v22 = vpop.f32.mrb[26].mxu1  ;;  %4945 = vmatprep.mubr.msk.bf16.mxu0 %vm5491_vm2, %v4944_v27  ;;  %v2657_v59 = vrot.slane %v3991_v1, 1  ;;  %v1482_v13 = vshll.u32 %v5749_v50, 16  ;;  %2499 = vmatpush1.bf16.msra.mxu0 %v4704_v8  ;;  %v1472_v40 = vrot.slane %v1470_v12, 1 }
 0x1ea   : > { %v1065_v42 = vsel %vm5465_vm13, %v5747_v44, 0.0  ;;  %v5759_v63 = vadd.f32 %v956_v22, %v5704_v43  ;;  %v958_v2 = vpop.f32.mrb[27].mxu1  ;;  %v1569_v21 = vrot.slane %v1567_v10, 1  ;;  %v1561_v25 = vrot.slane %v1559_v56, 1  ;;  %2500 = vmatprep.subr.bf16.mxu0 %v4712_v54  ;;  %v4716_v54 = vld [vmem:[#allocation8 + $0x1c0] ss:$8 sps:$4 sm:$0xff]  }
 0x1eb   : > { %v1066_v28 = vsel %vm5465_vm13, %v5752_v51, 0.0  ;;  %v5767_v19 = vadd.f32 %v958_v2, %v5709_v45  ;;  %2011 = vmatpush1.bf16.msra.mxu1 %v4707_v9  ;;  %v1468_v1 = vshrl.u32 %v4941_v32, 16  ;;  %v1484_v10 = vrot.slane %v1482_v13, 1 }
 0x1ec   : > { %v1069_v36 = vsel %vm5477_vm14, %v5759_v63, 0.0  ;;  %v1570_v33 = vsel %vm1442_vm3, %v1565_v39, %v1569_v21  ;;  %2012 = vmatprep.subr.bf16.mxu1 %v4715_v26  ;;  %v1562_v24 = vsel %vm1442_vm3, %v1557_v46, %v1561_v25  ;;  %v5781_v49 = vsel %vm2628_vm5, %v2651_v38, %v2659_v58  ;;  %v4724_v21 = vld [vmem:[#allocation8 + $0x1d0] ss:$8 sps:$4 sm:$0xff]   ;;  %v4727_v25 = vld [vmem:[#allocation8 + $0x3a0] ss:$8 sps:$4 sm:$0xff]  }
 0x1ed   : > { %v1070_v18 = vsel %vm5477_vm14, %v5767_v19, 0.0  ;;  %v2552_v34 = vld [vmem:[#allocation3 + $0x8] sm:$0xee]  ;;  %1985 = vmatprep.mubr.bf16.mxu1 %v1570_v33  ;;  %v5786_v9 = vsel %vm2628_vm5, %v2649_v16, %v2657_v59  ;;  %2501 = vmatpush1.bf16.msra.mxu0 %v4710_v52  ;;  %v5794_v56 = vpack.c.bf16 %v1069_v36, %v1065_v42  ;;  %v1480_v58 = vshrl.u32 %v5749_v50, 16  ;;  %v4729_v59 = vld [vmem:[#allocation8 + $0x3a4] ss:$8 sps:$4 sm:$0xff]  }
 0x1ee   : > { %1986 = vmatmul.mubr.bf16.gmra.mrb[52].mxu1 %v1562_v24  ;;  %v4125_v39 = vcombine.low %v2552_v34, %v5744_v31  ;;  %v5792_v46 = vpack.c.bf16 %v1070_v18, %v1066_v28  ;;  %2502 = vmatprep.subr.bf16.mxu0 %v4718_v29  ;;  %v4726_v16 = vld [vmem:[#allocation8 + $0x1d4] ss:$8 sps:$4 sm:$0xff]   ;;  %v1473_v2 = vor.u32 %v1472_v40, %v1468_v1  ;;  %vm3714_vm14 = vcmask 130048  }
 0x1ef   : > { %v962_v8 = vpop.f32.mrb[28].mxu1  ;;  %2013 = vmatpush1.bf16.msra.mxu1 %v4713_v23  ;;  %v4126_v12 = vcombine.high %v2552_v34, %v5744_v31  ;;  %v1475_v13 = vshll.u32 %v5794_v56, 16  ;;  %v1485_v36 = vor.u32 %v1484_v10, %v1480_v58  ;;  %v2636_v1 = vrot.slane %v5794_v56, 1  ;;  %v4735_v24 = vld [vmem:[#allocation8 + $0x3b4] ss:$8 sps:$4 sm:$0xff]  }
 0x1f0   : > { %v5790_v32 = vadd.f32 %v962_v8, %v5704_v43  ;;  %v964_v22 = vpop.f32.mrb[29].mxu1  ;;  %2014 = vmatprep.subr.bf16.mxu1 %v4722_v37  ;;  %v1487_v28 = vshll.u32 %v5792_v46, 16  ;;  %v2635_v52 = vrot.slane %v4125_v39, 1  ;;  %v2639_v34 = vrot.slane %v5792_v46, 1 }
 0x1f1   : > { %v5797_v14 = vadd.f32 %v964_v22, %v5709_v45  ;;  %v966_v38 = vpop.f32.mrb[30].mxu1  ;;  %2503 = vmatpush1.bf16.msra.mxu0 %v4716_v54  ;;  %v1477_v40 = vrot.slane %v1475_v13, 1  ;;  %v2638_v33 = vrot.slane %v4126_v12, 1 }
 0x1f2   : > { %v1073_v27 = vsel %vm5519_vm11, %v5790_v32, 0.0  ;;  %v5805_v42 = vadd.f32 %v966_v38, %v5704_v43  ;;  %v968_v26 = vpop.f32.mrb[31].mxu1  ;;  %v1489_v18 = vrot.slane %v1487_v28, 1  ;;  %2504 = vmatprep.subr.bf16.mxu0 %v4726_v16  ;;  %v5831_v39 = vsel %vm2628_vm5, %v2635_v52, %v2636_v1  ;;  %v4730_v38 = vld [vmem:[#allocation8 + $0x1e0] ss:$8 sps:$4 sm:$0xff]  }
 0x1f3   : > { %v1074_v50 = vsel %vm5519_vm11, %v5797_v14, 0.0  ;;  %v5813_v31 = vadd.f32 %v968_v26, %v5709_v45  ;;  %2015 = vmatpush1.bf16.msra.mxu1 %v4720_v5  ;;  %v5825_v8 = vsel %vm1442_vm3, %v1473_v2, %v1477_v40  ;;  %v5828_v30 = vsel %vm2628_vm5, %v2638_v33, %v2639_v34  ;;  %v4733_v5 = vld [vmem:[#allocation8 + $0x3b0] ss:$8 sps:$4 sm:$0xff]   ;;  %v4738_v26 = vld [vmem:[#allocation8 + $0x1f4] ss:$8 sps:$4 sm:$0xff]  }
 0x1f4   : > { %v1077_v23 = vsel %vm5538_vm15, %v5805_v42, 0.0  ;;  %2016 = vmatprep.subr.bf16.mxu1 %v4729_v59  ;;  %v1490_v37 = vsel %vm1442_vm3, %v1485_v36, %v1489_v18  ;;  %v1515_v59 = vshrl.u32 %v5792_v46, 16  ;;  %v1507_v28 = vshrl.u32 %v5794_v56, 16  ;;  %v4739_v33 = vld [vmem:[#allocation8 + $0x3c0] ss:$8 sps:$4 sm:$0xff]  }
 0x1f5   : > { %v1078_v29 = vsel %vm5538_vm15, %v5813_v31, 0.0  ;;  %2028 = vmatprep.mubr.bf16.mxu1 %v1490_v37  ;;  %2505 = vmatpush1.bf16.msra.mxu0 %v4724_v21  ;;  %v5838_v58 = vpack.c.bf16 %v1077_v23, %v1073_v27  ;;  %v4741_v21 = vld [vmem:[#allocation8 + $0x3c4] ss:$8 sps:$4 sm:$0xff]   ;;  %v4736_v23 = vld [vmem:[#allocation8 + $0x1f0] ss:$8 sps:$4 sm:$0xff]  }
 0x1f6   : > { %v5836_v16 = vpack.c.bf16 %v1078_v29, %v1074_v50  ;;  %2506 = vmatprep.subr.bf16.mxu0 %v4732_v17  ;;  %v1509_v29 = vor.u32 %v1507_v28, %v1477_v40  ;;  %v4747_v40 = vld [vmem:[#allocation8 + $0x3d4] ss:$8 sps:$4 sm:$0xff]  }
 0x1f7   : > { %v972_v10 = vpop.f32.mrb[32].mxu1  ;;  %2017 = vmatpush1.bf16.msra.mxu1 %v4727_v25  ;;  %v1511_v52 = vshll.u32 %v5838_v58, 16  ;;  %v1517_v25 = vor.u32 %v1515_v59, %v1489_v18  ;;  %v2645_v18 = vrot.slane %v5838_v58, 1 }
 0x1f8   : > { %v5834_v22 = vadd.f32 %v972_v10, %v5704_v43  ;;  %v974_v54 = vpop.f32.mrb[33].mxu1  ;;  %2018 = vmatprep.subr.bf16.mxu1 %v4735_v24  ;;  %v1519_v36 = vshll.u32 %v5836_v16, 16 }
 0x1f9   : > { %v5841_v2 = vadd.f32 %v974_v54, %v5709_v45  ;;  %v976_v12 = vpop.f32.mrb[34].mxu1  ;;  %2507 = vmatpush1.bf16.msra.mxu0 %v4730_v38  ;;  %v1513_v24 = vrot.slane %v1511_v52, 1  ;;  %v2647_v54 = vrot.slane %v5836_v16, 1  ;;  %v5877_v20 = vsel %vm2628_vm5, %v2636_v1, %v2645_v18 }
 0x1fa   : > { %v1081_v13 = vsel %vm5585_vm6, %v5834_v22, 0.0  ;;  %v5849_v50 = vadd.f32 %v976_v12, %v5704_v43  ;;  %v978_v27 = vpop.f32.mrb[35].mxu1  ;;  %v1521_v37 = vrot.slane %v1519_v36, 1  ;;  %2508 = vmatprep.subr.bf16.mxu0 %v4738_v26  ;;  %v1547_v1 = vshrl.u32 %v5836_v16, 16 }
 0x1fb   : > { %v1082_v46 = vsel %vm5585_vm6, %v5841_v2, 0.0  ;;  %v5857_v56 = vadd.f32 %v978_v27, %v5709_v45  ;;  %2019 = vmatpush1.bf16.msra.mxu1 %v4733_v5  ;;  %v5871_v38 = vsel %vm1442_vm3, %v1509_v29, %v1513_v24  ;;  %v5874_v28 = vsel %vm2628_vm5, %v2639_v34, %v2647_v54  ;;  %v4742_v27 = vld [vmem:[#allocation8 + $0x400] ss:$8 sps:$4 sm:$0xff]   ;;  %v4750_v34 = vld [vmem:[#allocation8 + $0x414] ss:$8 sps:$4 sm:$0xff]  }
 0x1fc   : > { %v1085_v17 = vsel %vm5614_vm9, %v5849_v50, 0.0  ;;  %2020 = vmatprep.subr.bf16.mxu1 %v4741_v21  ;;  %v5868_v12 = vsel %vm1442_vm3, %v1517_v25, %v1521_v37  ;;  %v4745_v21 = vld [vmem:[#allocation8 + $0x3d0] ss:$8 sps:$4 sm:$0xff]   ;;  %v1549_v16 = vor.u32 %v1547_v1, %v1521_v37  ;;  %v4756_v37 = vld [vmem:[#allocation8 + $0x424] ss:$8 sps:$4 sm:$0xff]   ;;  %v4971_v35 = vpack.c.bf16 %v5849_v50, %v5834_v22 }
 0x1fd   : > { %v1086_v10 = vsel %vm5614_vm9, %v5857_v56, 0.0  ;;  %2509 = vmatpush1.bf16.msra.mxu0 %v4736_v23  ;;  %v5882_v52 = vpack.c.bf16 %v1085_v17, %v1081_v13  ;;  %v4953_v17 = vpack.c.bf16 %v5732_v57, %v5725_v53  ;;  %v4776_v22 = vld [vmem:[#allocation8 + $0x480] ss:$8 sps:$4 sm:$0xff]  }
 0x1fe   : > { %v5880_v36 = vpack.c.bf16 %v1086_v10, %v1082_v46  ;;  %3001 = vmatprep.subr.bf16.mxu0 %v4744_v0  ;;  %v1539_v46 = vshrl.u32 %v5838_v58, 16  ;;  %v4956_v58 = vpack.c.bf16 %v5767_v19, %v5752_v51  ;;  %v4759_v51 = vld [vmem:[#allocation8 + $0x3f4] ss:$8 sps:$4 sm:$0xff]  }
 0x1ff   : > { %v982_v59 = vpop.f32.mrb[36].mxu1  ;;  %2021 = vmatpush1.bf16.msra.mxu1 %v4739_v33  ;;  %v1543_v13 = vshll.u32 %v5882_v52, 16  ;;  %v2653_v10 = vrot.slane %v5882_v52, 1  ;;  %v1571_v50 = vshrl.u32 %v5882_v52, 16  ;;  %v4789_v52 = vld [vmem:[#allocation8 + $0x4c0] ss:$8 sps:$4 sm:$0xff]  }
 0x200   : > { %v983_v5 = vadd.f32 %v982_v59, %v5704_v43  ;;  %v984_v26 = vpop.f32.mrb[37].mxu1  ;;  %2022 = vmatprep.subr.bf16.mxu1 %v4747_v40  ;;  %v1551_v23 = vshll.u32 %v5880_v36, 16  ;;  %4954 = vmatmul.mubr.msk.bf16.vlgmr.msra.gmra.mrb[0].mxu0 %vm5491_vm2, %v4953_v17  ;;  %v2655_v33 = vrot.slane %v5880_v36, 1  ;;  %v1541_v53 = vor.u32 %v1539_v46, %v1513_v24  ;;  %v4771_v46 = vld [vmem:[#allocation8 + $0x464] ss:$8 sps:$4 sm:$0xff]  }
 0x201   : > { %v985_v25 = vadd.f32 %v984_v26, %v5709_v45  ;;  %v986_v29 = vpop.f32.mrb[38].mxu1  ;;  %4957 = vmatprep.mubr.msk.bf16.mxu0 %vm5554_vm0, %v4956_v58  ;;  %3002 = vmatpush1.bf16.msra.mxu0 %v4742_v27  ;;  %v5905_v57 = vrot.slane %v1543_v13, 1  ;;  %v5911_v26 = vsel %vm2628_vm5, %v2645_v18, %v2653_v10  ;;  %v4754_v27 = vld [vmem:[#allocation8 + $0x420] ss:$8 sps:$4 sm:$0xff]   ;;  %v4760_v18 = vld [vmem:[#allocation8 + $0x430] ss:$8 sps:$4 sm:$0xff]  }
 0x202   : > { %v1089_v43 = vsel %vm5658_vm1, %v983_v5, 0.0  ;;  %v987_v59 = vpop.f32.mrb[39].mxu1  ;;  %v5903_v40 = vrot.slane %v1551_v23, 1  ;;  %3003 = vmatprep.subr.bf16.mxu0 %v4750_v34  ;;  %v5908_v5 = vsel %vm2628_vm5, %v2647_v54, %v2655_v33  ;;  %v4959_v54 = vpack.c.bf16 %v5759_v63, %v5747_v44  ;;  %v4765_v29 = vld [vmem:[#allocation8 + $0x444] ss:$8 sps:$4 sm:$0xff]  }
 0x203   : > { %v1090_v45 = vsel %vm5658_vm1, %v985_v25, 0.0  ;;  %2023 = vmatpush1.bf16.msra.mxu1 %v4745_v21  ;;  %v1546_v24 = vsel %vm1442_vm3, %v1541_v53, %v5905_v57  ;;  %v4757_v21 = vld [vmem:[#allocation8 + $0x3f0] ss:$8 sps:$4 sm:$0xff]   ;;  %v4762_v25 = vld [vmem:[#allocation8 + $0x434] ss:$8 sps:$4 sm:$0xff]   ;;  %v4965_v23 = vpack.c.bf16 %v5805_v42, %v5790_v32  ;;  %vm6182_vm1 = vcmask 523264  }
 0x204   : > { %v4256_v0 = vpack.c.bf16 %v1090_v45, %v1089_v43  ;;  %2024 = vmatprep.subr.bf16.mxu1 %v4753_v11  ;;  %v1554_v19 = vsel %vm1442_vm3, %v1549_v16, %v5903_v40  ;;  %v4962_v11 = vpack.c.bf16 %v5813_v31, %v5797_v14  ;;  %v4763_v44 = vld [vmem:[#allocation8 + $0x440] ss:$8 sps:$4 sm:$0xff]   ;;  %v4768_v14 = vld [vmem:[#allocation8 + $0x454] ss:$8 sps:$4 sm:$0xff]   ;;  %v4772_v42 = vld [vmem:[#allocation8 + $0x470] ss:$8 sps:$4 sm:$0xff]  }
 0x205   : > { %3004 = vmatpush1.bf16.msra.mxu0 %v4748_v60  ;;  %v4769_v13 = vld [vmem:[#allocation8 + $0x460] ss:$8 sps:$4 sm:$0xff]   ;;  %v4774_v32 = vld [vmem:[#allocation8 + $0x474] ss:$8 sps:$4 sm:$0xff]   ;;  %v4786_v53 = vld [vmem:[#allocation8 + $0x4b0] ss:$8 sps:$4 sm:$0xff]  }
 0x206   : > { %1220 = vst [vmem:[#allocation3 + $0x88] sm:$0x11] %v4256_v0  ;;  %3005 = vmatprep.subr.bf16.mxu0 %v4756_v37  ;;  %v4785_v0 = vld [vmem:[#allocation8 + $0x4a4] ss:$8 sps:$4 sm:$0xff]   ;;  %v4783_v60 = vld [vmem:[#allocation8 + $0x4a0] ss:$8 sps:$4 sm:$0xff]   ;;  %vm6183_vm7 = vmmov %vm6182_vm1 }
 0x207   : > { %2025 = vmatpush1.bf16.msra.mxu1 %v4751_v55  ;;  %v4791_v55 = vld [vmem:[#allocation8 + $0x4c4] ss:$8 sps:$4 sm:$0xff]   ;;  %v4794_v37 = vld [vmem:[#allocation8 + $0x4d4] ss:$8 sps:$4 sm:$0xff]   ;;  %vm6184_vm8 = vmmov %vm6182_vm1  ;;  %vm3802_vm2 = vcmask 7168  }
 0x208   : > { %2026 = vmatprep.subr.bf16.mxu1 %v4759_v51  ;;  %4960 = vmatmul.mubr.msk.bf16.gmra.mrb[4].mxu0 %vm5554_vm0, %v4959_v54  ;;  %v4792_v51 = vld [vmem:[#allocation8 + $0x4d0] ss:$8 sps:$4 sm:$0xff]   ;;  %v4806_v54 = vld [vmem:[#allocation8 + $0x514] ss:$8 sps:$4 sm:$0xff]   ;;  %vm6185_vm13 = vmmov %vm6182_vm1 }
 0x209   : > { %4963 = vmatprep.mubr.msk.bf16.mxu0 %vm5629_vm10, %v4962_v11  ;;  %3006 = vmatpush1.bf16.msra.mxu0 %v4754_v27  ;;  %v4798_v27 = vld [vmem:[#allocation8 + $0x4f0] ss:$8 sps:$4 sm:$0xff]  }
 0x20a   : > { %3007 = vmatprep.subr.bf16.mxu0 %v4762_v25  ;;  %v4801_v25 = vld [vmem:[#allocation8 + $0x500] ss:$8 sps:$4 sm:$0xff]   ;;  %v4804_v11 = vld [vmem:[#allocation8 + $0x510] ss:$8 sps:$4 sm:$0xff]  }
 0x20b   : > { %2027 = vmatpush1.bf16.msra.mxu1 %v4757_v21  ;;  %v4803_v21 = vld [vmem:[#allocation8 + $0x504] ss:$8 sps:$4 sm:$0xff]  }
 0x20d   : > { %v1302_v34 = vld [vmem:[#allocation3 + $0x88] sm:$0x11]  ;;  %3008 = vmatpush1.bf16.msra.mxu0 %v4760_v18  ;;  %v4809_v18 = vld [vmem:[#allocation8 + $0x524] ss:$8 sps:$4 sm:$0xff]  }
 0x20e   : > { %v3994_v1 = vcombine.high %v1302_v34, %v1302_v34  ;;  %v3993_v43 = vcombine.low %v1302_v34, %v1302_v34  ;;  %2029 = vmatmul.mubr.bf16.vlgmr.msra.gmra.mrb[40].mxu1 %v5825_v8  ;;  %3009 = vmatprep.subr.bf16.mxu0 %v4765_v29  ;;  %v4968_v8 = vpack.c.bf16 %v5857_v56, %v5841_v2  ;;  %v1579_v2 = vshrl.u32 %v5880_v36, 16  ;;  %v4807_v29 = vld [vmem:[#allocation8 + $0x520] ss:$8 sps:$4 sm:$0xff]   ;;  %v4812_v34 = vld [vmem:[#allocation8 + $0x534] ss:$8 sps:$4 sm:$0xff]  }
 0x20f   : > { %2038 = vmatprep.mubr.bf16.mxu1 %v5868_v12  ;;  %v4766_v12 = vld [vmem:[#allocation8 + $0x450] ss:$8 sps:$4 sm:$0xff]   ;;  %v1573_v36 = vor.u32 %v1571_v50, %v5905_v57  ;;  %v4797_v57 = vld [vmem:[#allocation8 + $0x4e4] ss:$8 sps:$4 sm:$0xff]  }
 0x210   : > { %v2663_v41 = vrot.slane %v3994_v1, 1  ;;  %v2661_v63 = vrot.slane %v3993_v43, 1  ;;  %4966 = vmatmul.mubr.msk.bf16.gmra.mrb[8].mxu0 %vm5629_vm10, %v4965_v23  ;;  %v1583_v45 = vshll.u32 %v3994_v1, 16  ;;  %v1581_v17 = vor.u32 %v1579_v2, %v5903_v40  ;;  %v4788_v40 = vld [vmem:[#allocation8 + $0x4b4] ss:$8 sps:$4 sm:$0xff]  }
 0x211   : > { %4969 = vmatprep.mubr.msk.bf16.mxu0 %vm5686_vm12, %v4968_v8  ;;  %3010 = vmatpush1.bf16.msra.mxu0 %v4763_v44  ;;  %v1575_v16 = vshll.u32 %v3993_v43, 16  ;;  %v4810_v1 = vld [vmem:[#allocation8 + $0x530] ss:$8 sps:$4 sm:$0xff]   ;;  %v4815_v43 = vld [vmem:[#allocation8 + $0x544] ss:$8 sps:$4 sm:$0xff]  }
 0x212   : > { %v5928_v31 = vsel %vm2628_vm5, %v2655_v33, %v2663_v41  ;;  %v5931_v59 = vsel %vm2628_vm5, %v2653_v10, %v2661_v63  ;;  %3011 = vmatprep.subr.bf16.mxu0 %v4768_v14  ;;  %v1585_v56 = vrot.slane %v1583_v45, 1  ;;  %v4779_v10 = vld [vmem:[#allocation8 + $0x490] ss:$8 sps:$4 sm:$0xff]   ;;  %v4821_v41 = vld [vmem:[#allocation8 + $0x564] ss:$8 sps:$4 sm:$0xff]  }
 0x213   : > { %v4816_v44 = vld [vmem:[#allocation8 + $0x550] ss:$8 sps:$4 sm:$0xff]   ;;  %v4827_v14 = vld [vmem:[#allocation8 + $0x584] ss:$8 sps:$4 sm:$0xff]   ;;  %v4842_v45 = vld [vmem:[#allocation8 + $0x5d4] ss:$8 sps:$4 sm:$0xff]  }
 0x214   : > { %v1586_v33 = vsel %vm1442_vm3, %v1581_v17, %v1585_v56  ;;  %v4822_v63 = vld [vmem:[#allocation8 + $0x570] ss:$8 sps:$4 sm:$0xff]   ;;  %v4833_v8 = vld [vmem:[#allocation8 + $0x5a4] ss:$8 sps:$4 sm:$0xff]   ;;  %v4848_v2 = vld [vmem:[#allocation8 + $0x5f4] ss:$8 sps:$4 sm:$0xff]  }
 0x215   : > { %3012 = vmatpush1.bf16.msra.mxu0 %v4766_v12  ;;  %v4828_v23 = vld [vmem:[#allocation8 + $0x590] ss:$8 sps:$4 sm:$0xff]   ;;  %v4831_v12 = vld [vmem:[#allocation8 + $0x5a0] ss:$8 sps:$4 sm:$0xff]  }
 0x216   : > { %2039 = vmatmul.mubr.bf16.gmra.mrb[44].mxu1 %v5871_v38  ;;  %3013 = vmatprep.subr.bf16.mxu0 %v4771_v46  ;;  %v4778_v38 = vld [vmem:[#allocation8 + $0x484] ss:$8 sps:$4 sm:$0xff]   ;;  %v4836_v46 = vld [vmem:[#allocation8 + $0x5b4] ss:$8 sps:$4 sm:$0xff]   ;;  %v4846_v56 = vld [vmem:[#allocation8 + $0x5f0] ss:$8 sps:$4 sm:$0xff]  }
 0x217   : > { %2048 = vmatprep.mubr.bf16.mxu1 %v1554_v19  ;;  %v4795_v19 = vld [vmem:[#allocation8 + $0x4e0] ss:$8 sps:$4 sm:$0xff]  }
 0x218   : > { %4972 = vmatmul.mubr.msk.bf16.gmra.mrb[12].mxu0 %vm5686_vm12, %v4971_v35  ;;  %v4845_v35 = vld [vmem:[#allocation8 + $0x5e4] ss:$8 sps:$4 sm:$0xff]   ;;  %v4855_v50 = vld [vmem:[%s6139_s5 + $0x58] sm:$0xff]  }
 0x219   : > { %3014 = vmatpush1.bf16.msra.mxu0 %v4769_v13  ;;  %3033 = vmatprep.mubr.bf16.mxu0 %v5593_v3  ;;  %v1577_v3 = vrot.slane %v1575_v16, 1  ;;  %v4839_v13 = vld [vmem:[#allocation8 + $0x5c4] ss:$8 sps:$4 sm:$0xff]  }
 0x21a   : > { %3015 = vmatprep.subr.bf16.mxu0 %v4774_v32  ;;  %v4840_v32 = vld [vmem:[#allocation8 + $0x5d0] ss:$8 sps:$4 sm:$0xff]   ;;  %v4850_v17 = vld [vmem:[%s6139_s5] sm:$0xff]  }
 0x21b   : > { %v1578_v58 = vsel %vm1442_vm3, %v1573_v36, %v1577_v3  ;;  %v4851_v16 = vld [vmem:[%s6139_s5 + $0x48] sm:$0xff]   ;;  %v4856_v3 = vld [vmem:[%s6139_s5 + $0x18] sm:$0xff]  }
 0x21d   : > { %3016 = vmatpush1.bf16.msra.mxu0 %v4772_v42  ;;  %v4843_v42 = vld [vmem:[#allocation8 + $0x5e0] ss:$8 sps:$4 sm:$0xff]  }
 0x21e   : > { %2049 = vmatmul.mubr.bf16.gmra.mrb[48].mxu1 %v1546_v24  ;;  %3017 = vmatprep.subr.bf16.mxu0 %v4778_v38  ;;  %v4800_v24 = vld [vmem:[#allocation8 + $0x4f4] ss:$8 sps:$4 sm:$0xff]   ;;  %v4849_v38 = vld [vmem:[%s6139_s5 + $0x40] sm:$0xff]  }
 0x21f   : > { %2058 = vmatprep.mubr.bf16.mxu1 %v1586_v33  ;;  %4257 = vmatprep.subr.bf16.mxu1 %v4849_v38  ;;  %v4852_v33 = vld [vmem:[%s6139_s5 + $0x8] sm:$0xff]  }
 0x220   : > { %4258 = vmatpush3.bf16.msra.mxu1 %v4850_v17 }
 0x221   : > { %3018 = vmatpush1.bf16.msra.mxu0 %v4776_v22  ;;  %4259 = vmatprep.subr.bf16.mxu1 %v4851_v16  ;;  %v4853_v22 = vld [vmem:[%s6139_s5 + $0x50] sm:$0xff]  }
 0x222   : > { %3019 = vmatprep.subr.bf16.mxu0 %v4781_v15  ;;  %v4854_v15 = vld [vmem:[%s6139_s5 + $0x10] sm:$0xff]  }
 0x224   : > { %4260 = vmatpush3.bf16.msra.mxu1 %v4852_v33 }
 0x225   : > { %3020 = vmatpush1.bf16.msra.mxu0 %v4779_v10  ;;  %4261 = vmatprep.subr.bf16.mxu1 %v4853_v22  ;;  %v4859_v10 = vld [vmem:[%s6139_s5 + $0x68] sm:$0xff]  }
 0x226   : > { %2059 = vmatmul.mubr.bf16.gmra.mrb[52].mxu1 %v1578_v58  ;;  %3021 = vmatprep.subr.bf16.mxu0 %v4785_v0 }
 0x228   : > { %4262 = vmatpush3.bf16.msra.mxu1 %v4854_v15 }
 0x229   : > { %3022 = vmatpush1.bf16.msra.mxu0 %v4783_v60  ;;  %4263 = vmatprep.subr.bf16.mxu1 %v4855_v50  ;;  %v4867_v50 = vld [vmem:[%s6141_s7 + $0x10] sm:$0xff]  }
 0x22a   : > { %3023 = vmatprep.subr.bf16.mxu0 %v4788_v40 }
 0x22c   : > { %4264 = vmatpush3.bf16.msra.mxu1 %v4856_v3 }
 0x22d   : > { %3024 = vmatpush1.bf16.msra.mxu0 %v4786_v53 }
 0x22e   : > { %3025 = vmatprep.subr.bf16.mxu0 %v4791_v55 }
 0x231   : > { %3026 = vmatpush1.bf16.msra.mxu0 %v4789_v52 }
 0x232   : > { %3027 = vmatprep.subr.bf16.mxu0 %v4794_v37 }
 0x235   : > { %3028 = vmatpush1.bf16.msra.mxu0 %v4792_v51 }
 0x236   : > { %3029 = vmatprep.subr.bf16.mxu0 %v4797_v57 }
 0x239   : > { %3030 = vmatpush1.bf16.msra.mxu0 %v4795_v19 }
 0x23a   : > { %3031 = vmatprep.subr.bf16.mxu0 %v4800_v24 }
 0x23d   : > { %3032 = vmatpush1.bf16.msra.mxu0 %v4798_v27  ;;  %v4865_v27 = vld [vmem:[%s6141_s7] sm:$0xff]  }
 0x23e   : > { %3074 = vmatprep.subr.bf16.mxu0 %v4803_v21 }
 0x240   : > { %3034 = vmatmul.mubr.bf16.vlgmr.msra.gmra.mrb[0].mxu0 %v5598_v6  ;;  %v4813_v6 = vld [vmem:[#allocation8 + $0x540] ss:$8 sps:$4 sm:$0xff]  }
 0x241   : > { %3043 = vmatprep.mubr.bf16.mxu0 %v5665_v61  ;;  %3075 = vmatpush1.bf16.msra.mxu0 %v4801_v25  ;;  %v4818_v61 = vld [vmem:[#allocation8 + $0x554] ss:$8 sps:$4 sm:$0xff]  }
 0x242   : > { %3076 = vmatprep.subr.bf16.mxu0 %v4806_v54 }
 0x245   : > { %3077 = vmatpush1.bf16.msra.mxu0 %v4804_v11  ;;  %v3163_v11 = vld [vmem:[%s6138_s4] sm:$0x3] }
 0x246   : > { %3078 = vmatprep.subr.bf16.mxu0 %v4809_v18  ;;  %v6034_v18 = vrot.slane %v3163_v11, %v673_v7 }
 0x248   : > { %3044 = vmatmul.mubr.bf16.gmra.mrb[4].mxu0 %v5670_v62  ;;  %v4819_v62 = vld [vmem:[#allocation8 + $0x560] ss:$8 sps:$4 sm:$0xff]  }
 0x249   : > { %3053 = vmatprep.mubr.bf16.mxu0 %v5714_v47  ;;  %3079 = vmatpush1.bf16.msra.mxu0 %v4807_v29  ;;  %v4824_v47 = vld [vmem:[#allocation8 + $0x574] ss:$8 sps:$4 sm:$0xff]  }
 0x24a   : > { %3080 = vmatprep.subr.bf16.mxu0 %v4812_v34  ;;  %v6181_v34 = vsub.s32 1, %v5413_v4 }
 0x24d   : > { %3081 = vmatpush1.bf16.msra.mxu0 %v4810_v1  ;;  %v6038_v1 = vrot.slane %v3163_v11, %v6181_v34 }
 0x24e   : > { %3082 = vmatprep.subr.bf16.mxu0 %v4815_v43 }
 0x250   : > { %3054 = vmatmul.mubr.bf16.gmra.mrb[8].mxu0 %v5719_v48  ;;  %v4825_v48 = vld [vmem:[#allocation8 + $0x580] ss:$8 sps:$4 sm:$0xff]  }
 0x251   : > { %3063 = vmatprep.mubr.bf16.mxu0 %v5781_v49  ;;  %3083 = vmatpush1.bf16.msra.mxu0 %v4813_v6  ;;  %v4830_v49 = vld [vmem:[#allocation8 + $0x594] ss:$8 sps:$4 sm:$0xff]  }
 0x252   : > { %3084 = vmatprep.subr.bf16.mxu0 %v4818_v61 }
 0x255   : > { %3085 = vmatpush1.bf16.msra.mxu0 %v4816_v44 }
 0x256   : > { %3086 = vmatprep.subr.bf16.mxu0 %v4821_v41 }
 0x258   : > { %3064 = vmatmul.mubr.bf16.gmra.mrb[12].mxu0 %v5786_v9  ;;  %v4834_v9 = vld [vmem:[#allocation8 + $0x5b0] ss:$8 sps:$4 sm:$0xff]  }
 0x259   : > { %3087 = vmatpush1.bf16.msra.mxu0 %v4819_v62  ;;  %3106 = vmatprep.mubr.bf16.mxu0 %v5828_v30  ;;  %v4837_v30 = vld [vmem:[#allocation8 + $0x5c0] ss:$8 sps:$4 sm:$0xff]  }
 0x25a   : > { %3088 = vmatprep.subr.bf16.mxu0 %v4824_v47 }
 0x25d   : > { %3089 = vmatpush1.bf16.msra.mxu0 %v4822_v63 }
 0x25e   : > { %3090 = vmatprep.subr.bf16.mxu0 %v4827_v14 }
 0x261   : > { %3091 = vmatpush1.bf16.msra.mxu0 %v4825_v48 }
 0x262   : > { %3092 = vmatprep.subr.bf16.mxu0 %v4830_v49 }
 0x265   : > { %3093 = vmatpush1.bf16.msra.mxu0 %v4828_v23 }
 0x266   : > { %3094 = vmatprep.subr.bf16.mxu0 %v4833_v8 }
 0x269   : > { %3095 = vmatpush1.bf16.msra.mxu0 %v4831_v12 }
 0x26a   : > { %3096 = vmatprep.subr.bf16.mxu0 %v4836_v46 }
 0x26d   : > { %3097 = vmatpush1.bf16.msra.mxu0 %v4834_v9 }
 0x26e   : > { %3098 = vmatprep.subr.bf16.mxu0 %v4839_v13 }
 0x271   : > { %3099 = vmatpush1.bf16.msra.mxu0 %v4837_v30 }
 0x272   : > { %3100 = vmatprep.subr.bf16.mxu0 %v4842_v45 }
 0x275   : > { %3101 = vmatpush1.bf16.msra.mxu0 %v4840_v32 }
 0x276   : > { %3102 = vmatprep.subr.bf16.mxu0 %v4845_v35 }
 0x279   : > { %3103 = vmatpush1.bf16.msra.mxu0 %v4843_v42 }
 0x27a   : > { %3104 = vmatprep.subr.bf16.mxu0 %v4848_v2 }
 0x27d   : > { %3105 = vmatpush1.bf16.msra.mxu0 %v4846_v56  ;;  %v4866_v56 = vld [vmem:[%s6141_s7 + $0x8] sm:$0xff]  }
 0x280   : > { %3107 = vmatmul.mubr.bf16.vlgmr.msra.gmra.mrb[0].mxu0 %v5831_v39  ;;  %v4857_v39 = vld [vmem:[%s6139_s5 + $0x60] sm:$0xff]  }
 0x281   : > { %3116 = vmatprep.mubr.bf16.mxu0 %v5874_v28  ;;  %v4858_v28 = vld [vmem:[%s6139_s5 + $0x20] sm:$0xff]   ;;  %4265 = vmatprep.subr.bf16.mxu1 %v4857_v39 }
 0x282   : > { %4266 = vmatpush3.bf16.msra.mxu1 %v4858_v28 }
 0x283   : > { %4267 = vmatprep.subr.bf16.mxu1 %v4859_v10 }
 0x288   : > { %3117 = vmatmul.mubr.bf16.gmra.mrb[4].mxu0 %v5877_v20  ;;  %v4860_v20 = vld [vmem:[%s6139_s5 + $0x28] sm:$0xff]  }
 0x289   : > { %3126 = vmatprep.mubr.bf16.mxu0 %v5908_v5  ;;  %4268 = vmatpush3.bf16.msra.mxu1 %v4860_v20  ;;  %v4861_v5 = vld [vmem:[%s6139_s5 + $0x70] sm:$0xff]  }
 0x28a   : > { %4269 = vmatprep.subr.bf16.mxu1 %v4861_v5 }
 0x290   : > { %3127 = vmatmul.mubr.bf16.gmra.mrb[8].mxu0 %v5911_v26  ;;  %v4862_v26 = vld [vmem:[%s6139_s5 + $0x30] sm:$0xff]  }
 0x291   : > { %3136 = vmatprep.mubr.bf16.mxu0 %v5928_v31  ;;  %4270 = vmatpush3.bf16.msra.mxu1 %v4862_v26  ;;  %v4863_v31 = vld [vmem:[%s6139_s5 + $0x78] sm:$0xff]  }
 0x292   : > { %4271 = vmatprep.subr.bf16.mxu1 %v4863_v31 }
 0x298   : > { %3137 = vmatmul.mubr.bf16.gmra.mrb[12].mxu0 %v5931_v59  ;;  %v4864_v59 = vld [vmem:[%s6139_s5 + $0x38] sm:$0xff]  }
 0x299   : > { %4272 = vmatpush3.bf16.msra.mxu1 %v4864_v59 }
 0x29a   : > { %4317 = vmatprep.subr.bf16.mxu1 %v4865_v27 }
 0x2e1   : > { %v2030_v36 = vpop.f32.mrb[40].mxu1 }
 0x2e2   : > { %v2032_v0 = vpop.f32.mrb[41].mxu1 }
 0x2e3   : > { %v2034_v58 = vpop.f32.mrb[42].mxu1 }
 0x2e4   : > { %v2036_v60 = vpop.f32.mrb[43].mxu1 }
 0x2e9   : > { %v2040_v40 = vpop.f32.mrb[44].mxu1 }
 0x2ea   : > { %v2042_v53 = vpop.f32.mrb[45].mxu1 }
 0x2eb   : > { %v2044_v55 = vpop.f32.mrb[46].mxu1 }
 0x2ec   : > { %v2046_v52 = vpop.f32.mrb[47].mxu1 }
 0x2f1   : > { %v2050_v37 = vpop.f32.mrb[48].mxu1 }
 0x2f2   : > { %v2052_v51 = vpop.f32.mrb[49].mxu1 }
 0x2f3   : > { %v2054_v57 = vpop.f32.mrb[50].mxu1 }
 0x2f4   : > { %v6016_v19 = vpop.f32.mrb[51].mxu1 }
 0x2f9   : > { %v6018_v24 = vpop.f32.mrb[52].mxu1 }
 0x2fa   : > { %v6023_v21 = vpop.f32.mrb[53].mxu1 }
 0x2fb   : > { %v6025_v25 = vpop.f32.mrb[54].mxu1 }
 0x2fc   : > { %v6027_v54 = vpop.f32.mrb[55].mxu1 }
 0x353   : > { %v3108_v29 = vpop.f32.mrb[0].mxu0 }
 0x354   : > { %v4357_v43 = vadd.f32 %v3108_v29, %v2030_v36  ;;  %v3110_v6 = vpop.f32.mrb[1].mxu0 }
 0x355   : > { %v4358_v61 = vadd.f32 %v3110_v6, %v2032_v0  ;;  %v3112_v44 = vpop.f32.mrb[2].mxu0 }
 0x356   : > { %v3175_v41 = vadd.f32 %v4357_v43, %v6034_v18  ;;  %v4359_v62 = vadd.f32 %v3112_v44, %v2034_v58  ;;  %v3114_v47 = vpop.f32.mrb[3].mxu0 }
 0x357   : > { %v3176_v63 = vadd.f32 %v4358_v61, %v6038_v1  ;;  %v4360_v14 = vadd.f32 %v3114_v47, %v2036_v60 }
 0x358   : > { %v3177_v48 = vadd.f32 %v4359_v62, %v6034_v18  ;;  %v3191_v49 = vmax.f32 %v3175_v41, 0.0 }
 0x359   : > { %v3178_v7 = vadd.f32 %v4360_v14, %v6038_v1  ;;  %v3192_v4 = vmax.f32 %v3176_v63, 0.0 }
 0x35a   : > { %v3193_v23 = vmax.f32 %v3177_v48, 0.0 }
 0x35b   : > { %v3194_v8 = vmax.f32 %v3178_v7, 0.0  ;;  %v3118_v12 = vpop.f32.mrb[4].mxu0 }
 0x35c   : > { %v3207_v46 = vpack.c.bf16 %v3193_v23, %v3191_v49  ;;  %v4361_v9 = vadd.f32 %v3118_v12, %v2040_v40  ;;  %v3120_v13 = vpop.f32.mrb[5].mxu0 }
 0x35d   : > { %v4362_v30 = vadd.f32 %v3120_v13, %v2042_v53  ;;  %v3122_v45 = vpop.f32.mrb[6].mxu0  ;;  %v3208_v32 = vpack.c.bf16 %v3194_v8, %v3192_v4  ;;  %v4872_v4 = vld [vmem:[%s6141_s7 + $0x38] sm:$0xff]   ;;  %v4873_v8 = vld [vmem:[%s6143_s9] sm:$0xff]  }
 0x35e   : > { %v3179_v35 = vadd.f32 %v4361_v9, %v6034_v18  ;;  %v4363_v42 = vadd.f32 %v3122_v45, %v2044_v55  ;;  %v3124_v2 = vpop.f32.mrb[7].mxu0 }
 0x35f   : > { %v3180_v38 = vadd.f32 %v4362_v30, %v6038_v1  ;;  %v4364_v17 = vadd.f32 %v3124_v2, %v2046_v52  ;;  %3382 = vmatprep.mubr.bf16.mxu1 %v3208_v32 }
 0x360   : > { %v3181_v16 = vadd.f32 %v4363_v42, %v6034_v18  ;;  %3383 = vmatmul.mubr.bf16.vlgmr.msra.gmra.mrb[56].mxu1 %v3207_v46  ;;  %v3195_v22 = vmax.f32 %v3179_v35, 0.0  ;;  %v4191_v46 = vld [vmem:[#allocation10] ss:$0 sm:$0xff] }
 0x361   : > { %v3182_v33 = vadd.f32 %v4364_v17, %v6038_v1  ;;  %4318 = vmatpush3.bf16.msra.mxu1 %v4865_v27  ;;  %v3196_v3 = vmax.f32 %v3180_v38, 0.0 }
 0x362   : > { %v3197_v15 = vmax.f32 %v3181_v16, 0.0  ;;  %4319 = vmatprep.subr.bf16.mxu1 %v4866_v56 }
 0x363   : > { %v3198_v39 = vmax.f32 %v3182_v33, 0.0  ;;  %v3128_v28 = vpop.f32.mrb[8].mxu0 }
 0x364   : > { %v4365_v10 = vadd.f32 %v3128_v28, %v2050_v37  ;;  %v3130_v20 = vpop.f32.mrb[9].mxu0  ;;  %v3209_v5 = vpack.c.bf16 %v3197_v15, %v3195_v22 }
 0x365   : > { %v4366_v26 = vadd.f32 %v3130_v20, %v2052_v51  ;;  %v3132_v31 = vpop.f32.mrb[10].mxu0  ;;  %v3210_v59 = vpack.c.bf16 %v3198_v39, %v3196_v3  ;;  %4320 = vmatpush3.bf16.msra.mxu1 %v4866_v56 }
 0x366   : > { %v3183_v36 = vadd.f32 %v4365_v10, %v6034_v18  ;;  %v4367_v0 = vadd.f32 %v3132_v31, %v2054_v57  ;;  %v3134_v58 = vpop.f32.mrb[11].mxu0  ;;  %4321 = vmatprep.subr.bf16.mxu1 %v4867_v50 }
 0x367   : > { %v3184_v60 = vadd.f32 %v4366_v26, %v6038_v1  ;;  %v4368_v40 = vadd.f32 %v3134_v58, %v6016_v19  ;;  %3390 = vmatprep.mubr.bf16.mxu1 %v3210_v59 }
 0x368   : > { %v3185_v53 = vadd.f32 %v4367_v0, %v6034_v18  ;;  %3391 = vmatmul.mubr.bf16.gmra.mrb[60].mxu1 %v3209_v5  ;;  %v3199_v52 = vmax.f32 %v3183_v36, 0.0  ;;  %v4874_v36 = vld [vmem:[%s6143_s9 + $0x8] sm:$0xff]  }
 0x369   : > { %v3186_v55 = vadd.f32 %v4368_v40, %v6038_v1  ;;  %4322 = vmatpush3.bf16.msra.mxu1 %v4867_v50  ;;  %v3200_v51 = vmax.f32 %v3184_v60, 0.0 }
 0x36a   : > { %v3201_v37 = vmax.f32 %v3185_v53, 0.0 }
 0x36b   : > { %v3202_v27 = vmax.f32 %v3186_v55, 0.0  ;;  %v3138_v11 = vpop.f32.mrb[12].mxu0 }
 0x36c   : > { %v4369_v57 = vadd.f32 %v3138_v11, %v6018_v24  ;;  %v3140_v29 = vpop.f32.mrb[13].mxu0  ;;  %v3211_v34 = vpack.c.bf16 %v3201_v37, %v3199_v52 }
 0x36d   : > { %v4370_v43 = vadd.f32 %v3140_v29, %v6023_v21  ;;  %v3142_v6 = vpop.f32.mrb[14].mxu0  ;;  %v3212_v19 = vpack.c.bf16 %v3202_v27, %v3200_v51 }
 0x36e   : > { %v3187_v61 = vadd.f32 %v4369_v57, %v6034_v18  ;;  %v4371_v44 = vadd.f32 %v3142_v6, %v6025_v25  ;;  %v3144_v41 = vpop.f32.mrb[15].mxu0  ;;  %v4868_v25 = vld [vmem:[%s6141_s7 + $0x18] sm:$0xff]  }
 0x36f   : > { %v3188_v62 = vadd.f32 %v4370_v43, %v6038_v1  ;;  %v4372_v47 = vadd.f32 %v3144_v41, %v6027_v54  ;;  %3398 = vmatprep.mubr.bf16.mxu1 %v3212_v19  ;;  %4323 = vmatprep.subr.bf16.mxu1 %v4868_v25  ;;  %v4869_v54 = vld [vmem:[%s6141_s7 + $0x20] sm:$0xff]   ;;  %v4876_v41 = vld [vmem:[%s6143_s9 + $0x18] sm:$0xff]  }
 0x370   : > { %v3189_v63 = vadd.f32 %v4371_v44, %v6034_v18  ;;  %3399 = vmatmul.mubr.bf16.gmra.mrb[64].mxu1 %v3211_v34  ;;  %v3203_v14 = vmax.f32 %v3187_v61, 0.0  ;;  %v4870_v18 = vld [vmem:[%s6141_s7 + $0x28] sm:$0xff]   ;;  %v4875_v44 = vld [vmem:[%s6143_s9 + $0x10] sm:$0xff]  }
 0x371   : > { %v3190_v24 = vadd.f32 %v4372_v47, %v6038_v1  ;;  %v3204_v21 = vmax.f32 %v3188_v62, 0.0  ;;  %4324 = vmatpush3.bf16.msra.mxu1 %v4868_v25  ;;  %v4871_v1 = vld [vmem:[%s6141_s7 + $0x30] sm:$0xff]   ;;  %v4208_v62 = vld [vmem:[%s6142_s8] ss:$0 sm:$0xff] }
 0x372   : > { %v3205_v48 = vmax.f32 %v3189_v63, 0.0  ;;  %4325 = vmatprep.subr.bf16.mxu1 %v4869_v54 }
 0x373   : > { %v3206_v7 = vmax.f32 %v3190_v24, 0.0 }
 0x374   : > { %v3213_v49 = vpack.c.bf16 %v3205_v48, %v3203_v14 }
 0x375   : > { %v3214_v23 = vpack.c.bf16 %v3206_v7, %v3204_v21  ;;  %4326 = vmatpush3.bf16.msra.mxu1 %v4869_v54 }
 0x376   : > { %4327 = vmatprep.subr.bf16.mxu1 %v4870_v18 }
 0x377   : > { %3406 = vmatprep.mubr.bf16.mxu1 %v3214_v23 }
 0x378   : > { %3407 = vmatmul.mubr.bf16.gmra.mrb[68].mxu1 %v3213_v49 }
 0x379   : > { %4328 = vmatpush3.bf16.msra.mxu1 %v4870_v18 }
 0x37a   : > { %4329 = vmatprep.subr.bf16.mxu1 %v4871_v1 }
 0x37d   : > { %4330 = vmatpush3.bf16.msra.mxu1 %v4871_v1 }
 0x37e   : > { %4331 = vmatprep.subr.bf16.mxu1 %v4872_v4 }
 0x381   : > { %4332 = vmatpush3.bf16.msra.mxu1 %v4872_v4 }
 0x382   : > { %4341 = vmatprep.subr.bf16.mxu1 %v4873_v8 }
 0x433   : > { %v4273_v12 = vpop.f32.mrb[56].mxu1 }
 0x434   : > { %v4274_v9 = vpop.f32.mrb[57].mxu1 }
 0x435   : > { %v4275_v13 = vadd.f32 %v4274_v9, %v4273_v12  ;;  %v4276_v30 = vpop.f32.mrb[58].mxu1 }
 0x436   : > { %v4277_v45 = vpop.f32.mrb[59].mxu1 }
 0x437   : > { %v3385_v32 = vadd.f32 %v4275_v13, %v4191_v46  ;;  %v4278_v35 = vadd.f32 %v4277_v45, %v4276_v30 }
 0x439   : > { %v3388_v42 = vadd.f32 %v4278_v35, %v4191_v46  ;;  %v3415_v2 = vmax.f32 %v3385_v32, 0.0 }
 0x43b   : > { %v3416_v56 = vmax.f32 %v3388_v42, 0.0  ;;  %v4279_v38 = vpop.f32.mrb[60].mxu1 }
 0x43c   : > { %v4280_v17 = vpop.f32.mrb[61].mxu1 }
 0x43d   : > { %v4281_v16 = vadd.f32 %v4280_v17, %v4279_v38  ;;  %v4282_v33 = vpop.f32.mrb[62].mxu1  ;;  %v3423_v22 = vpack.c.bf16 %v3416_v56, %v3415_v2 }
 0x43e   : > { %v4283_v15 = vpop.f32.mrb[63].mxu1 }
 0x43f   : > { %v3393_v50 = vadd.f32 %v4281_v16, %v4191_v46  ;;  %v4284_v3 = vadd.f32 %v4283_v15, %v4282_v33  ;;  %4333 = vmatprep.mubr.bf16.mxu1 %v3423_v22  ;;  %v4217_v16 = vld [vmem:[%s6144_s10] ss:$0 sm:$0xff] }
 0x441   : > { %v3396_v39 = vadd.f32 %v4284_v3, %v4191_v46  ;;  %v3417_v28 = vmax.f32 %v3393_v50, 0.0 }
 0x443   : > { %v3418_v10 = vmax.f32 %v3396_v39, 0.0  ;;  %v4285_v20 = vpop.f32.mrb[64].mxu1  ;;  %v4226_v39 = vld [vmem:[%s6145_s11] ss:$0 sm:$0xff] }
 0x444   : > { %v4286_v5 = vpop.f32.mrb[65].mxu1 }
 0x445   : > { %v3424_v26 = vpack.c.bf16 %v3418_v10, %v3417_v28  ;;  %v4287_v31 = vadd.f32 %v4286_v5, %v4285_v20  ;;  %v4288_v59 = vpop.f32.mrb[66].mxu1 }
 0x446   : > { %v4289_v0 = vpop.f32.mrb[67].mxu1 }
 0x447   : > { %v3401_v58 = vadd.f32 %v4287_v31, %v4191_v46  ;;  %v4290_v60 = vadd.f32 %v4289_v0, %v4288_v59  ;;  %4334 = vmatmul.mubr.bf16.vlgmr.msra.gmra.mrb[72].mxu1 %v3424_v26 }
 0x448   : > { %4342 = vmatpush3.bf16.msra.mxu1 %v4873_v8 }
 0x449   : > { %v3404_v40 = vadd.f32 %v4290_v60, %v4191_v46  ;;  %4343 = vmatprep.subr.bf16.mxu1 %v4874_v36  ;;  %v3419_v53 = vmax.f32 %v3401_v58, 0.0 }
 0x44b   : > { %v3420_v55 = vmax.f32 %v3404_v40, 0.0  ;;  %v4291_v52 = vpop.f32.mrb[68].mxu1 }
 0x44c   : > { %v4292_v37 = vpop.f32.mrb[69].mxu1  ;;  %4344 = vmatpush3.bf16.msra.mxu1 %v4874_v36 }
 0x44d   : > { %v4293_v51 = vadd.f32 %v4292_v37, %v4291_v52  ;;  %v4294_v27 = vpop.f32.mrb[70].mxu1  ;;  %v3425_v11 = vpack.c.bf16 %v3420_v55, %v3419_v53  ;;  %4345 = vmatprep.subr.bf16.mxu1 %v4875_v44 }
 0x44e   : > { %v4295_v57 = vpop.f32.mrb[71].mxu1 }
 0x44f   : > { %v3409_v29 = vadd.f32 %v4293_v51, %v4191_v46  ;;  %v4296_v34 = vadd.f32 %v4295_v57, %v4294_v27  ;;  %4337 = vmatprep.mubr.bf16.mxu1 %v3425_v11 }
 0x450   : > { %4346 = vmatpush3.bf16.msra.mxu1 %v4875_v44 }
 0x451   : > { %v3412_v43 = vadd.f32 %v4296_v34, %v4191_v46  ;;  %v3421_v6 = vmax.f32 %v3409_v29, 0.0  ;;  %4347 = vmatprep.subr.bf16.mxu1 %v4876_v41 }
 0x453   : > { %v3422_v19 = vmax.f32 %v3412_v43, 0.0 }
 0x454   : > { %4348 = vmatpush3.bf16.msra.mxu1 %v4876_v41 }
 0x455   : > { %v3426_v61 = vpack.c.bf16 %v3422_v19, %v3421_v6 }
 0x457   : > { %4338 = vmatmul.mubr.bf16.gmra.mrb[76].mxu1 %v3426_v61 }
 0x51a   : > { %v4335_v47 = vpop.f32.mrb[72].mxu1 }
 0x51b   : > { %v3541_v63 = vadd.f32 %v4335_v47, %v4208_v62  ;;  %v3532_v24 = vpop.f32.mrb[73].mxu1 }
 0x51c   : > { %v3533_v14 = vadd.f32 %v4208_v62, %v3532_v24  ;;  %v4336_v48 = vpop.f32.mrb[74].mxu1 }
 0x51d   : > { %v3544_v21 = vadd.f32 %v4336_v48, %v4208_v62  ;;  %v3535_v7 = vpop.f32.mrb[75].mxu1  ;;  %v3565_v23 = vmax.f32 %v3541_v63, 0.0 }
 0x51e   : > { %v3536_v49 = vadd.f32 %v4208_v62, %v3535_v7  ;;  %v3563_v54 = vmax.f32 %v3533_v14, 0.0  ;;  %v4227_v7 = vld [vmem:[#allocation5] ss:$0 sm:$0xff] }
 0x51f   : > { %v3566_v25 = vmax.f32 %v3544_v21, 0.0 }
 0x520   : > { %v3564_v18 = vmax.f32 %v3536_v49, 0.0 }
 0x521   : > { %v3572_v1 = vpack.c.bf16 %v3566_v25, %v3565_v23 }
 0x522   : > { %v3571_v4 = vpack.c.bf16 %v3564_v18, %v3563_v54 }
 0x524   : > { %4349 = vmatprep.mubr.msk.bf16.mxu1 %vm6182_vm1, %v3571_v4 }
 0x525   : > { %4350 = vmatmul.mubr.msk.bf16.vlgmr.msra.gmra.mrb[80].mxu1 %vm6183_vm7, %v3572_v1 }
 0x52a   : > { %v4339_v8 = vpop.f32.mrb[76].mxu1 }
 0x52b   : > { %v3557_v12 = vadd.f32 %v4339_v8, %v4208_v62  ;;  %v3548_v46 = vpop.f32.mrb[77].mxu1 }
 0x52c   : > { %v3549_v9 = vadd.f32 %v4208_v62, %v3548_v46  ;;  %v4340_v13 = vpop.f32.mrb[78].mxu1 }
 0x52d   : > { %v3560_v30 = vadd.f32 %v4340_v13, %v4208_v62  ;;  %v3551_v45 = vpop.f32.mrb[79].mxu1  ;;  %v3569_v35 = vmax.f32 %v3557_v12, 0.0 }
 0x52e   : > { %v3552_v32 = vadd.f32 %v4208_v62, %v3551_v45  ;;  %v3567_v2 = vmax.f32 %v3549_v9, 0.0 }
 0x52f   : > { %v3570_v42 = vmax.f32 %v3560_v30, 0.0 }
 0x530   : > { %v3568_v56 = vmax.f32 %v3552_v32, 0.0 }
 0x531   : > { %v3574_v38 = vpack.c.bf16 %v3570_v42, %v3569_v35 }
 0x532   : > { %v3573_v17 = vpack.c.bf16 %v3568_v56, %v3567_v2 }
 0x534   : > { %4353 = vmatprep.mubr.msk.bf16.mxu1 %vm6184_vm8, %v3573_v17 }
 0x535   : > { %4354 = vmatmul.mubr.msk.bf16.gmra.mrb[84].mxu1 %vm6185_vm13, %v3574_v38 }
 0x5f8   : > { %v4351_v33 = vpop.f32.mrb[80].mxu1 }
 0x5f9   : > { %v3669_v22 = vadd.f32 %v4351_v33, %v4217_v16  ;;  %v3660_v15 = vpop.f32.mrb[81].mxu1 }
 0x5fa   : > { %v3661_v50 = vadd.f32 %v4217_v16, %v3660_v15  ;;  %v4352_v3 = vpop.f32.mrb[82].mxu1 }
 0x5fb   : > { %v3693_v28 = vmax.f32 %v3669_v22, 0.0  ;;  %v3672_v10 = vadd.f32 %v4352_v3, %v4217_v16  ;;  %v3663_v20 = vpop.f32.mrb[83].mxu1 }
 0x5fc   : > { %v3691_v5 = vmax.f32 %v3661_v50, 0.0  ;;  %v3664_v26 = vadd.f32 %v4217_v16, %v3663_v20 }
 0x5fd   : > { %v3708_v31 = vmul.f32 %v4226_v39, %v3693_v28  ;;  %v3694_v36 = vmax.f32 %v3672_v10, 0.0 }
 0x5fe   : > { %v3692_v59 = vmax.f32 %v3664_v26, 0.0  ;;  %v3706_v58 = vmul.f32 %v4226_v39, %v3691_v5 }
 0x5ff   : > { %v3721_v0 = vsel %vm3714_vm14, %v3708_v31, 0.0  ;;  %v3709_v55 = vmul.f32 %v4226_v39, %v3694_v36 }
 0x600   : > { %3722 = vadd.xlane.f32.xlu0 %v3721_v0  ;;  %v3707_v60 = vmul.f32 %v4226_v39, %v3692_v59  ;;  %v3715_v53 = vsel %vm3714_vm14, %v3706_v58, 0.0 }
 0x601   : > { %v3724_v52 = vsel %vm3714_vm14, %v3709_v55, 0.0 }
 0x602   : > { %v3718_v40 = vsel %vm3714_vm14, %v3707_v60, 0.0 }
 0x603   : > { %3719 = vadd.xlane.f32.xlu1 %v3718_v40 }
 0x604   : > { %3716 = vadd.xlane.f32.xlu0 %v3715_v53 }
 0x608   : > { %3725 = vadd.xlane.f32.xlu0 %v3724_v52  ;;  %v4355_v37 = vpop.f32.mrb[84].mxu1 }
 0x609   : > { %v3685_v51 = vadd.f32 %v4355_v37, %v4217_v16  ;;  %v3676_v27 = vpop.f32.mrb[85].mxu1 }
 0x60a   : > { %v3677_v11 = vadd.f32 %v4217_v16, %v3676_v27  ;;  %v4356_v57 = vpop.f32.mrb[86].mxu1 }
 0x60b   : > { %v3688_v29 = vadd.f32 %v4356_v57, %v4217_v16  ;;  %v3679_v34 = vpop.f32.mrb[87].mxu1  ;;  %v3697_v43 = vmax.f32 %v3685_v51, 0.0 }
 0x60c   : > { %v3695_v6 = vmax.f32 %v3677_v11, 0.0  ;;  %v3680_v19 = vadd.f32 %v4217_v16, %v3679_v34 }
 0x60d   : > { %v3698_v61 = vmax.f32 %v3688_v29, 0.0  ;;  %v3712_v63 = vmul.f32 %v4226_v39, %v3697_v43 }
 0x60e   : > { %v3696_v44 = vmax.f32 %v3680_v19, 0.0  ;;  %v3710_v41 = vmul.f32 %v4226_v39, %v3695_v6 }
 0x60f   : > { %v3713_v14 = vmul.f32 %v4226_v39, %v3698_v61  ;;  %v3733_v48 = vsel %vm3714_vm14, %v3712_v63, 0.0 }
 0x610   : > { %v3727_v62 = vsel %vm3714_vm14, %v3710_v41, 0.0  ;;  %v3711_v47 = vmul.f32 %v4226_v39, %v3696_v44 }
 0x611   : > { %3728 = vadd.xlane.f32.xlu1 %v3727_v62  ;;  %v3736_v21 = vsel %vm3714_vm14, %v3713_v14, 0.0 }
 0x612   : > { %v3730_v24 = vsel %vm3714_vm14, %v3711_v47, 0.0 }
 0x613   : > { %3731 = vadd.xlane.f32.xlu0 %v3730_v24 }
 0x615   : > { %3734 = vadd.xlane.f32.xlu1 %v3733_v48 }
 0x617   : > { %3737 = vadd.xlane.f32.xlu0 %v3736_v21 }
 0x68d   : > { %v3723_v49 = vpop.xlane.xlu0 %3722 }
 0x68e   : > { %v3748_v23 = vadd.f32 %v4227_v7, %v3723_v49 }
 0x690   : > { %v4230_v25 = vmul.f32 -1.442695, %v3748_v23  ;;  %v3720_v54 = vpop.xlane.xlu1 %3719 }
 0x691   : > { %v3747_v18 = vadd.f32 %v4227_v7, %v3720_v54  ;;  %v3717_v1 = vpop.xlane.xlu0 %3716 }
 0x692   : > { %4877 = vpow2.f32 %v4230_v25  ;;  %v3746_v4 = vadd.f32 %v4227_v7, %v3717_v1 }
 0x693   : > { %v4229_v8 = vmul.f32 -1.442695, %v3747_v18 }
 0x694   : > { %v4228_v12 = vmul.f32 -1.442695, %v3746_v4 }
 0x695   : > { %4879 = vpow2.f32 %v4229_v8  ;;  %v3726_v46 = vpop.xlane.xlu0 %3725 }
 0x696   : > { %4881 = vpow2.f32 %v4228_v12  ;;  %v3749_v9 = vadd.f32 %v4227_v7, %v3726_v46 }
 0x698   : > { %v4231_v13 = vmul.f32 -1.442695, %v3749_v9 }
 0x69a   : > { %4883 = vpow2.f32 %v4231_v13 }
 0x69c   : > { %v4878_v30 = vpop.eup %4877 }
 0x69d   : > { %v3780_v45 = vadd.f32 1.0, %v4878_v30 }
 0x69e   : > { %v3729_v32 = vpop.xlane.xlu1 %3728 }
 0x69f   : > { %v4880_v35 = vpop.eup %4879  ;;  %4885 = vrcp.f32 %v3780_v45  ;;  %v3750_v42 = vadd.f32 %v4227_v7, %v3729_v32 }
 0x6a0   : > { %v4882_v2 = vpop.eup %4881  ;;  %v3779_v56 = vadd.f32 1.0, %v4880_v35  ;;  %v3732_v38 = vpop.xlane.xlu0 %3731 }
 0x6a1   : > { %v3778_v17 = vadd.f32 1.0, %v4882_v2  ;;  %v4232_v16 = vmul.f32 -1.442695, %v3750_v42  ;;  %v3751_v33 = vadd.f32 %v4227_v7, %v3732_v38 }
 0x6a2   : > { %4887 = vrcp.f32 %v3779_v56  ;;  %v3735_v22 = vpop.xlane.xlu1 %3734 }
 0x6a3   : > { %4889 = vrcp.f32 %v3778_v17  ;;  %v4233_v15 = vmul.f32 -1.442695, %v3751_v33  ;;  %v3752_v50 = vadd.f32 %v4227_v7, %v3735_v22 }
 0x6a4   : > { %v4884_v3 = vpop.eup %4883  ;;  %4891 = vpow2.f32 %v4232_v16  ;;  %v3738_v39 = vpop.xlane.xlu0 %3737 }
 0x6a5   : > { %v3781_v28 = vadd.f32 1.0, %v4884_v3  ;;  %4893 = vpow2.f32 %v4233_v15  ;;  %v4234_v10 = vmul.f32 -1.442695, %v3752_v50  ;;  %v3753_v20 = vadd.f32 %v4227_v7, %v3738_v39 }
 0x6a7   : > { %4895 = vrcp.f32 %v3781_v28  ;;  %v4235_v5 = vmul.f32 -1.442695, %v3753_v20 }
 0x6a8   : > { %4897 = vpow2.f32 %v4234_v10 }
 0x6a9   : > { %v4886_v26 = vpop.eup %4885  ;;  %4899 = vpow2.f32 %v4235_v5 }
 0x6aa   : > { %3805 = vst.msk [vmem:[%s5281_s20 + $0x10] sm:$0xff] %vm3802_vm2, %v4886_v26 }
 0x6ac   : > { %v4888_v31 = vpop.eup %4887 }
 0x6ad   : > { %v4890_v59 = vpop.eup %4889  ;;  %3804 = vst.msk [vmem:[%s5281_s20 + $0x8] sm:$0xff] %vm3802_vm2, %v4888_v31 }
 0x6ae   : > { %v4892_v36 = vpop.eup %4891  ;;  %3803 = vst.msk [vmem:[%s5281_s20] sm:$0xff] %vm3802_vm2, %v4890_v59 }
 0x6af   : > { %v4894_v0 = vpop.eup %4893  ;;  %v3782_v58 = vadd.f32 1.0, %v4892_v36 }
 0x6b0   : > { %v3783_v60 = vadd.f32 1.0, %v4894_v0 }
 0x6b1   : > { %v4896_v40 = vpop.eup %4895  ;;  %4901 = vrcp.f32 %v3782_v58 }
 0x6b2   : > { %v4898_v53 = vpop.eup %4897  ;;  %3806 = vst.msk [vmem:[%s5281_s20 + $0x18] sm:$0xff] %vm3802_vm2, %v4896_v40  ;;  %4903 = vrcp.f32 %v3783_v60 }
 0x6b3   : > { %v4900_v55 = vpop.eup %4899  ;;  %v3784_v52 = vadd.f32 1.0, %v4898_v53 }
 0x6b4   : > { %v3785_v37 = vadd.f32 1.0, %v4900_v55 }
 0x6b5   : > { %4905 = vrcp.f32 %v3784_v52 }
 0x6b6   : > { %4907 = vrcp.f32 %v3785_v37 }
 0x6bb   : > { %v4902_v51 = vpop.eup %4901 }
 0x6bc   : > { %v4904_v27 = vpop.eup %4903  ;;  %3807 = vst.msk [vmem:[%s5281_s20 + $0x20] sm:$0xff] %vm3802_vm2, %v4902_v51 }
 0x6bd   : > { %3808 = vst.msk [vmem:[%s5281_s20 + $0x28] sm:$0xff] %vm3802_vm2, %v4904_v27 }
 0x6bf   : > { %v4906_v11 = vpop.eup %4905 }
 0x6c0   : > { %v4908_v57 = vpop.eup %4907  ;;  %3809 = vst.msk [vmem:[%s5281_s20 + $0x30] sm:$0xff] %vm3802_vm2, %v4906_v11 }
 0x6c1   : > { %3810 = vst.msk [vmem:[%s5281_s20 + $0x38] sm:$0xff] %vm3802_vm2, %v4908_v57 }
 0x6c2 PF: > { %s6186_s15 = sld [smem:[#allocation15_spill]] }
 0x6c8   : > { %s27_s27 = sadd.s32 1, %s6186_s15  }
 0x6c9   : > { %p24_p2 = scmp.ge.s32.totalorder %s27_s27, 4  }
 0x6cb   :  { %26 = sbr.rel (!%p24_p2) target bundleno = 5 (0x5), region = 162 }
 0x6d2   :  { %3833 = vsyncpa [#allocation7], 1 }
 0x6d3   :  { %3835 = vsyncpa [#allocation7 + $0x1], 1 }
 0x6d4   :  { %3836 = vsyncpa [#allocation9], 1 }
 0x6d5   :  { %3837 = vsyncmov [#allocation4] }
 0x6d8   :  { %s3838_s26 = vpop.sfrf %3837 }
 0x6d9   :  { %p4238_p3 = scmp.ne.s32.totalorder %s3838_s26, 0 }
 0x6db   :  { %3842 = shalt.err (%p4238_p3)  }

</bundles_post_ra>
